<compile_context>
chip_gen: v7x
topology: tpu7x:2x2x1
jax: 0.10.0
libtpu: 0.0.40
codegen_flags: <defaults>
</compile_context>

<pallas_src>
import jax
import jax.numpy as jnp
from jax.experimental import pallas as pl
from jax.experimental.pallas import tpu as pltpu

EPS = 1e-5


def conv_bn_relu_kernel(w_ref, x_ref, gamma_ref, beta_ref, o_ref):
    # x arrives as f32 (single HBM read); cast to bf16 on the VPU just before
    # the MXU op. Weight block is already bf16.
    x_bf16 = x_ref[...].astype(jnp.bfloat16)
    # 1x1 conv as matmul: (Cb, Cin) @ (Cin, M) -> (Cb, M), f32 accumulation.
    y = jnp.dot(w_ref[...], x_bf16, preferred_element_type=jnp.float32)

    # One-pass BatchNorm2d training-mode batch statistics per output channel
    # (reduction over all N*H*W pixels). Keep everything f32.
    m = jnp.float32(y.shape[1])
    s1 = jnp.sum(y, axis=1, keepdims=True)          # (Cb, 1)
    s2 = jnp.sum(y * y, axis=1, keepdims=True)      # (Cb, 1)
    mean = s1 / m
    var = jnp.maximum(s2 / m - mean * mean, 0.0)    # biased var, clamp tiny negatives
    inv = jax.lax.rsqrt(var + EPS)

    scale = inv * gamma_ref[...]                    # (Cb, 1)
    shift = beta_ref[...] - mean * scale            # (Cb, 1)
    # Fused affine + ReLU; no separate full-size `diff` temporary.
    o_ref[...] = jnp.maximum(y * scale + shift, 0.0)


def prepare_params(weight, gamma, beta):
    """One-time parameter prep: reshape + dtype cast (do NOT redo per call)."""
    Cout, Cin = weight.shape[0], weight.shape[1]
    w2d = weight.reshape(Cout, Cin).astype(jnp.bfloat16)      # (Cout, Cin) bf16
    gamma2d = gamma.reshape(Cout, 1).astype(jnp.float32)
    beta2d = beta.reshape(Cout, 1).astype(jnp.float32)
    return w2d, gamma2d, beta2d


def conv_bn_relu(x_nchw, w2d, gamma2d, beta2d):
    """x_nchw: (1, Cin, H, W) f32; w2d: (Cout, Cin) bf16; gamma2d/beta2d: (Cout, 1) f32."""
    N, Cin, H, W = x_nchw.shape
    assert N == 1, "channel-major zero-copy layout assumes batch size 1"
    Cout = w2d.shape[0]
    M = N * H * W

    # Zero-data-movement layout prep: reshape only, keep f32 (cast happens in-kernel).
    x2d = x_nchw.reshape(Cin, M)                               # (Cin, M) f32

    # Split Cout into 2 independent blocks (BN stats are per-channel), cheap
    # sequential steps on 1-TC chips, shardable across TCs on v7x.
    n_blocks = 2 if (Cout % 2 == 0 and (Cout // 2) % 8 == 0) else 1
    cb = Cout // n_blocks

    grid_spec = pltpu.PrefetchScalarGridSpec(
        num_scalar_prefetch=0,
        grid=(n_blocks,),
        in_specs=[
            pl.BlockSpec((cb, Cin), lambda i: (i, 0)),    # weight block (bf16)
            pl.BlockSpec((Cin, M), lambda i: (0, 0)),     # full x (f32), fetched once
            pl.BlockSpec((cb, 1), lambda i: (i, 0)),      # gamma block
            pl.BlockSpec((cb, 1), lambda i: (i, 0)),      # beta block
        ],
        out_specs=pl.BlockSpec((cb, M), lambda i: (i, 0)),
    )

    cost = pl.CostEstimate(
        flops=2 * M * Cin * Cout,
        transcendentals=Cout,  # rsqrt per channel
        bytes_accessed=(Cin * M * 4)        # x read, f32 (in-kernel bf16 cast)
        + (Cout * Cin * 2)                  # weight, bf16
        + (2 * Cout * 4)                    # gamma + beta
        + (Cout * M * 4),                   # output, f32
    )

    y2d = pl.pallas_call(
        conv_bn_relu_kernel,
        out_shape=jax.ShapeDtypeStruct((Cout, M), jnp.float32),
        grid_spec=grid_spec,
        compiler_params=pltpu.CompilerParams(
            dimension_semantics=("parallel",)
        ),
        cost_estimate=cost,
    )(w2d, x2d, gamma2d, beta2d)

    # (Cout, M) -> (1, Cout, H, W): pure reshape, no transpose.
    return y2d.reshape(N, Cout, H, W)


def reference(x, weight, gamma, beta):
    """Pure-JAX f32 reference of the PyTorch module's forward (training mode)."""
    Cout, Cin = weight.shape[0], weight.shape[1]
    y = jnp.einsum("oc,nchw->nohw", weight.reshape(Cout, Cin), x)
    mean = jnp.mean(y, axis=(0, 2, 3), keepdims=True)
    var = jnp.mean((y - mean) ** 2, axis=(0, 2, 3), keepdims=True)  # biased
    yn = (y - mean) * jax.lax.rsqrt(var + EPS)
    yn = yn * gamma.reshape(1, -1, 1, 1) + beta.reshape(1, -1, 1, 1)
    return jnp.maximum(yn, 0.0)


if __name__ == "__main__":
    # Shapes implied by the module: Conv2d(1776 -> 192, 1x1), input (1, 1776, 14, 14)
    N, Cin, H, W, Cout = 1, 1776, 14, 14, 192

    key = jax.random.PRNGKey(0)
    kx, kw = jax.random.split(key)
    x = jax.random.normal(kx, (N, Cin, H, W), dtype=jnp.float32)

    # Deterministic parameter init (synthetic; mirrors shapes of the PyTorch module)
    fan_in = Cin  # kernel is 1x1
    w_scale = 1.0 / jnp.sqrt(jnp.float32(fan_in))
    weight = jax.random.normal(kw, (Cout, Cin, 1, 1), dtype=jnp.float32) * w_scale
    gamma = jnp.ones((Cout,), dtype=jnp.float32)   # BatchNorm2d affine weight default
    beta = jnp.zeros((Cout,), dtype=jnp.float32)   # BatchNorm2d affine bias default

    w2d, gamma2d, beta2d = prepare_params(weight, gamma, beta)

    out = conv_bn_relu(x, w2d, gamma2d, beta2d)
    jax.block_until_ready(out)

    assert out.shape == (N, Cout, H, W)
    assert out.dtype == jnp.float32

    # Correctness vs. f32 reference; tolerance covers the bf16 MXU operands.
    ref = reference(x, weight, gamma, beta)
    max_err = float(jnp.max(jnp.abs(out - ref)))
    assert max_err < 0.1, f"max abs error too large: {max_err}"

    print("KERNEL_OK")
</pallas_src>

<mosaic_0001>
module attributes {stable_mosaic.version = 11 : i64} {
  func.func @conv_bn_relu_kernel(%arg0: i32, %arg1: memref<96x1776xbf16, #tpu.memory_space<vmem>>, %arg2: memref<1776x196xf32, #tpu.memory_space<vmem>>, %arg3: memref<96x1xf32, #tpu.memory_space<vmem>>, %arg4: memref<96x1xf32, #tpu.memory_space<vmem>>, %arg5: memref<96x196xf32, #tpu.memory_space<vmem>>) attributes {dimension_semantics = [#tpu.dimension_semantics<parallel>], iteration_bounds = array<i64: 2>, scalar_prefetch = 0 : i64, scratch_operands = 0 : i64, tpu.core_type = #tpu.core_type<tc>, window_params = [{transform_indices = @transform_0, window_bounds = array<i64: 96, 1776>}, {pipeline_mode = #tpu.pipeline_mode<synchronous>, transform_indices = @transform_1, window_bounds = array<i64: 1776, 196>}, {transform_indices = @transform_2, window_bounds = array<i64: 96, 1>}, {transform_indices = @transform_3, window_bounds = array<i64: 96, 1>}, {transform_indices = @transform_4, window_bounds = array<i64: 96, 196>}]} {
    %c0 = arith.constant 0 : index
    %c0_0 = arith.constant 0 : index
    %0 = vector.load %arg2[%c0, %c0_0] : memref<1776x196xf32, #tpu.memory_space<vmem>>, vector<1776x196xf32>
    %1 = arith.truncf %0 : vector<1776x196xf32> to vector<1776x196xbf16>
    %c0_1 = arith.constant 0 : index
    %c0_2 = arith.constant 0 : index
    %2 = vector.load %arg1[%c0_1, %c0_2] : memref<96x1776xbf16, #tpu.memory_space<vmem>>, vector<96x1776xbf16>
    %cst = arith.constant dense<0.000000e+00> : vector<96x196xf32>
    %3 = tpu.matmul %2, %1, %cst {dimension_numbers = #tpu.dot_dimension_numbers<[1], [0], [0], [1], [0, 0, 1, 1], [], []>} : vector<96x1776xbf16>, vector<1776x196xbf16>, vector<96x196xf32> -> vector<96x196xf32>
    %cst_3 = arith.constant dense<0.000000e+00> : vector<96xf32>
    %4 = vector.multi_reduction <add>, %3, %cst_3 [1] : vector<96x196xf32> to vector<96xf32>
    %5 = vector.shape_cast %4 : vector<96xf32> to vector<96x1xf32>
    %6 = arith.mulf %3, %3 : vector<96x196xf32>
    %cst_4 = arith.constant dense<0.000000e+00> : vector<96xf32>
    %7 = vector.multi_reduction <add>, %6, %cst_4 [1] : vector<96x196xf32> to vector<96xf32>
    %8 = vector.shape_cast %7 : vector<96xf32> to vector<96x1xf32>
    %cst_5 = arith.constant 1.960000e+02 : f32
    %9 = vector.broadcast %cst_5 : f32 to vector<96x1xf32>
    %10 = arith.divf %5, %9 : vector<96x1xf32>
    %cst_6 = arith.constant 1.960000e+02 : f32
    %11 = vector.broadcast %cst_6 : f32 to vector<96x1xf32>
    %12 = arith.divf %8, %11 : vector<96x1xf32>
    %13 = arith.mulf %10, %10 : vector<96x1xf32>
    %14 = arith.subf %12, %13 : vector<96x1xf32>
    %cst_7 = arith.constant 0.000000e+00 : f32
    %15 = vector.broadcast %cst_7 : f32 to vector<96x1xf32>
    %16 = arith.maximumf %14, %15 : vector<96x1xf32>
    %cst_8 = arith.constant 9.99999974E-6 : f32
    %17 = vector.broadcast %cst_8 : f32 to vector<96x1xf32>
    %18 = arith.addf %16, %17 : vector<96x1xf32>
    %19 = math.rsqrt %18 : vector<96x1xf32>
    %c0_9 = arith.constant 0 : index
    %c0_10 = arith.constant 0 : index
    %20 = vector.load %arg3[%c0_9, %c0_10] : memref<96x1xf32, #tpu.memory_space<vmem>>, vector<96x1xf32>
    %21 = arith.mulf %19, %20 : vector<96x1xf32>
    %c0_11 = arith.constant 0 : index
    %c0_12 = arith.constant 0 : index
    %22 = vector.load %arg4[%c0_11, %c0_12] : memref<96x1xf32, #tpu.memory_space<vmem>>, vector<96x1xf32>
    %23 = arith.mulf %10, %21 : vector<96x1xf32>
    %24 = arith.subf %22, %23 : vector<96x1xf32>
    %25 = vector.broadcast %21 : vector<96x1xf32> to vector<96x196xf32>
    %26 = arith.mulf %3, %25 : vector<96x196xf32>
    %27 = vector.broadcast %24 : vector<96x1xf32> to vector<96x196xf32>
    %28 = arith.addf %26, %27 : vector<96x196xf32>
    %cst_13 = arith.constant 0.000000e+00 : f32
    %29 = vector.broadcast %cst_13 : f32 to vector<96x196xf32>
    %30 = arith.maximumf %28, %29 : vector<96x196xf32>
    %c0_14 = arith.constant 0 : index
    %c0_15 = arith.constant 0 : index
    %31 = vector.load %arg5[%c0_14, %c0_15] : memref<96x196xf32, #tpu.memory_space<vmem>>, vector<96x196xf32>
    tpu.vector_store %arg5[%c0_14, %c0_15], %30 {strides = array<i32>} : memref<96x196xf32, #tpu.memory_space<vmem>>, vector<96x196xf32>,
    return
  }
  func.func @transform_0(%arg0: i32) -> (i32, i32) {
    %c0_i32 = arith.constant 0 : i32
    %c0_i32_0 = arith.constant 0 : i32
    return %arg0, %c0_i32 : i32, i32
  }
  func.func @transform_1(%arg0: i32) -> (i32, i32) {
    %c0_i32 = arith.constant 0 : i32
    %c0_i32_0 = arith.constant 0 : i32
    %c0_i32_1 = arith.constant 0 : i32
    return %c0_i32, %c0_i32_0 : i32, i32
  }
  func.func @transform_2(%arg0: i32) -> (i32, i32) {
    %c0_i32 = arith.constant 0 : i32
    %c0_i32_0 = arith.constant 0 : i32
    return %arg0, %c0_i32 : i32, i32
  }
  func.func @transform_3(%arg0: i32) -> (i32, i32) {
    %c0_i32 = arith.constant 0 : i32
    %c0_i32_0 = arith.constant 0 : i32
    return %arg0, %c0_i32 : i32, i32
  }
  func.func @transform_4(%arg0: i32) -> (i32, i32) {
    %c0_i32 = arith.constant 0 : i32
    %c0_i32_0 = arith.constant 0 : i32
    return %arg0, %c0_i32 : i32, i32
  }
}

</mosaic_0001>

<bundles_post_ra>
// kernel: tpu_custom_call.1
= control target key start
LH: loop header
LB: loop body
LE: loop exit
PB: predicated region body
PF: predicated region fallthrough
CT: control target
= control target key end

     0   :  { %9 = vsyncpa [#allocation3], 0  ;;  %s5111_s0 = inlined_call_operand.vmem [shape: bf16[192,1776], index: 0, kind: input, shape index: {}]   ;;  %s5112_s1 = inlined_call_operand.vmem [shape: f32[1776,196], index: 1, kind: input, shape index: {}]   ;;  %s5113_s2 = inlined_call_operand.vmem [shape: f32[192,1], index: 2, kind: input, shape index: {}]   ;;  %s5114_s3 = inlined_call_operand.vmem [shape: f32[192,1], index: 3, kind: input, shape index: {}]   ;;  %s5115_s4 = inlined_call_operand.hbm [shape: f32[192,196], index: 4, kind: output, shape index: {}]  }
   0x1   :  { %11 = vsyncpa [#allocation3 + $0x1], 0  ;;  %s3231_s15 = smov 0   ;;  %s3233_s16 = smov 0  }
   0x2   :  { %s3235_s17 = smov 0   ;;  %s3237_s18 = smov 0  }
   0x3 LB: > { %s3252_s19 = sadd.s32 4294967295, %s3200_s18   ;;  %s2664_s20 = sadd.s32 4294967294, %s3200_s18   ;;  %s3200_s18 = sphi %s3237_s18, %s5122_s18   ;;  %s3196_s17 = sphi %s3235_s17, %s5121_s17   ;;  %s3192_s16 = sphi %s3233_s16, %s5120_s16   ;;  %s3188_s15 = sphi %s3231_s15, %s5119_s15  }
   0x4   : > { %s3256_s21 = sadd.s32 1, %s3200_s18   ;;  %s123_s22 = sadd.s32 1, %s3196_s17 }
   0x5   : > { %s120_s23 = ssub.s32 %s3200_s18, %s3256_s21  ;;  %p133_p0 = scmp.ne.s32.totalorder %s3196_s17, %s3192_s16 }
   0x6   : > { %p121_p1 = scmp.eq.s32.totalorder %s120_s23, 0  ;;  %p134_p2 = scmp.eq.s32.totalorder %s3252_s19, 1 }
   0x7   : > { %p139_p3 = scmp.ne.s32.totalorder %s3192_s16, %s3188_s15  ;;  %p140_p4 = scmp.eq.s32.totalorder %s2664_s20, 1 }
   0x8   : > { %s3267_s24 = scalar_select %p121_p1, %s3196_s17, %s123_s22  }
   0x9   : > { %p3269_p5 = por %p134_p2, %p133_p0  ;;  %p3273_p6 = por %p140_p4, %p139_p3 }
   0xa   : > { %p2667_p7 = scmp.ge.s32.totalorder %s3200_s18, 1  ;;  %p189_p8 = scmp.lt.s32.totalorder %s3200_s18, 3 }
   0xc   : > { %p190_p9 = pnand %p2667_p7, %p189_p8 }
   0xd   : > { %v248_v0 = vld [vmem:[%s5112_s1 + $0x8] sm:$0xff] (!%p190_p9)  ;;  %v250_v1 = vld [vmem:[%s5112_s1 + $0x18] sm:$0xff] (!%p190_p9)  ;;  %v247_v5 = vld [vmem:[%s5112_s1] sm:$0xff] (!%p190_p9)  ;;  %s226_s28 = smul.u32 (!%p190_p9), 12, %s3252_s19  ;;  %vm1411_vm0 = vcmask (!%p190_p9), 916480   ;;  %vm2081_vm1 = vcmask (!%p190_p9), 556032  }
   0xe   : > { %193 = sbr.rel (%p190_p9) target bundleno = 869 (0x365), region = 36  ;;  %v440_v2 = vld [vmem:[%s5112_s1 + $0x608] sm:$0xff] (!%p190_p9)  ;;  %v692_v3 = vpack.c.bf16 (!%p190_p9), %v250_v1, %v248_v0  ;;  %v442_v4 = vld [vmem:[%s5112_s1 + $0x618] sm:$0xff] (!%p190_p9)  ;;  %v249_v6 = vld [vmem:[%s5112_s1 + $0x10] sm:$0xff] (!%p190_p9)  ;;  %s3203_s7 = smov (!%p190_p9), [#allocation2]  }
   0xf   : > { %v788_v7 = vpack.c.bf16 (!%p190_p9), %v442_v4, %v440_v2  ;;  %v691_v8 = vpack.c.bf16 (!%p190_p9), %v249_v6, %v247_v5  ;;  %v439_v9 = vld [vmem:[%s5112_s1 + $0x600] sm:$0xff] (!%p190_p9)  ;;  %v441_v10 = vld [vmem:[%s5112_s1 + $0x610] sm:$0xff] (!%p190_p9)  ;;  %v252_v11 = vld [vmem:[%s5112_s1 + $0x28] sm:$0xff] (!%p190_p9)  ;;  %p3486_p10 = scmp.lt.s32.totalorder (!%p190_p9), %s226_s28, 23  ;;  %s2767_s22 = smul.u32 (!%p190_p9), 3072, %s3252_s19 }
  0x10   : > { %1430 = vmatprep.subr.bf16.mxu1 (!%p190_p9), %v692_v3  ;;  %v787_v12 = vpack.c.bf16 (!%p190_p9), %v441_v10, %v439_v9  ;;  %v254_v13 = vld [vmem:[%s5112_s1 + $0x38] sm:$0xff] (!%p190_p9)  ;;  %v444_v14 = vld [vmem:[%s5112_s1 + $0x628] sm:$0xff] (!%p190_p9)  ;;  %v251_v18 = vld [vmem:[%s5112_s1 + $0x20] sm:$0xff] (!%p190_p9) }
  0x11   : > { %v446_v15 = vld [vmem:[%s5112_s1 + $0x638] sm:$0xff] (!%p190_p9)  ;;  %1709 = vmatprep.subr.bf16.mxu0 (!%p190_p9), %v788_v7  ;;  %1431 = vmatpush1.bf16.msra.mxu1 (!%p190_p9), %v691_v8  ;;  %v694_v16 = vpack.c.bf16 (!%p190_p9), %v254_v13, %v252_v11  ;;  %v253_v19 = vld [vmem:[%s5112_s1 + $0x30] sm:$0xff] (!%p190_p9)  ;;  %v443_v20 = vld [vmem:[%s5112_s1 + $0x620] sm:$0xff] (!%p190_p9)  ;;  %s5063_s30 = scalar_lea.hbm (!%p190_p9), %s5115_s4, %s2767_s22 }
  0x12   : > { %v790_v17 = vpack.c.bf16 (!%p190_p9), %v446_v15, %v444_v14  ;;  %1710 = vmatpush1.bf16.msra.mxu0 (!%p190_p9), %v787_v12  ;;  %v693_v21 = vpack.c.bf16 (!%p190_p9), %v253_v19, %v251_v18  ;;  %v445_v22 = vld [vmem:[%s5112_s1 + $0x630] sm:$0xff] (!%p190_p9)  ;;  %v256_v23 = vld [vmem:[%s5112_s1 + $0x48] sm:$0xff] (!%p190_p9)  ;;  %v258_v24 = vld [vmem:[%s5112_s1 + $0x58] sm:$0xff] (!%p190_p9) }
  0x13   : > { %1432 = vmatprep.subr.bf16.mxu1 (!%p190_p9), %v694_v16  ;;  %v789_v25 = vpack.c.bf16 (!%p190_p9), %v445_v22, %v443_v20  ;;  %v696_v26 = vpack.c.bf16 (!%p190_p9), %v258_v24, %v256_v23  ;;  %v448_v27 = vld [vmem:[%s5112_s1 + $0x648] sm:$0xff] (!%p190_p9)  ;;  %v450_v28 = vld [vmem:[%s5112_s1 + $0x658] sm:$0xff] (!%p190_p9)  ;;  %v255_v29 = vld [vmem:[%s5112_s1 + $0x40] sm:$0xff] (!%p190_p9) }
  0x14   : > { %1711 = vmatprep.subr.bf16.mxu0 (!%p190_p9), %v790_v17  ;;  %v792_v30 = vpack.c.bf16 (!%p190_p9), %v450_v28, %v448_v27  ;;  %v257_v31 = vld [vmem:[%s5112_s1 + $0x50] sm:$0xff] (!%p190_p9)  ;;  %v447_v32 = vld [vmem:[%s5112_s1 + $0x640] sm:$0xff] (!%p190_p9)  ;;  %v260_v35 = vld [vmem:[%s5112_s1 + $0x68] sm:$0xff] (!%p190_p9) }
  0x15   : > { %v449_v33 = vld [vmem:[%s5112_s1 + $0x650] sm:$0xff]  ;;  %1433 = vmatpush1.bf16.msra.mxu1 %v693_v21  ;;  %v695_v34 = vpack.c.bf16 %v257_v31, %v255_v29  ;;  %v262_v36 = vld [vmem:[%s5112_s1 + $0x78] sm:$0xff]  ;;  %v452_v37 = vld [vmem:[%s5112_s1 + $0x668] sm:$0xff]  ;;  %s5124_s28 = smov (!%p3486_p10, %s226_s28), 23 }
  0x16   : > { %1712 = vmatpush1.bf16.msra.mxu0 %v789_v25  ;;  %1434 = vmatprep.subr.bf16.mxu1 %v696_v26  ;;  %v791_v38 = vpack.c.bf16 %v449_v33, %v447_v32  ;;  %v698_v39 = vpack.c.bf16 %v262_v36, %v260_v35  ;;  %v454_v40 = vld [vmem:[%s5112_s1 + $0x678] sm:$0xff]  ;;  %v259_v41 = vld [vmem:[%s5112_s1 + $0x60] sm:$0xff]  ;;  %v261_v42 = vld [vmem:[%s5112_s1 + $0x70] sm:$0xff]  ;;  %s2943_s5 = smul.u32 56, %s5124_s28 }
  0x17   : > { %1713 = vmatprep.subr.bf16.mxu0 %v792_v30  ;;  %v794_v43 = vpack.c.bf16 %v454_v40, %v452_v37  ;;  %v451_v44 = vld [vmem:[%s5112_s1 + $0x660] sm:$0xff]  ;;  %v453_v45 = vld [vmem:[%s5112_s1 + $0x670] sm:$0xff]  ;;  %v264_v46 = vld [vmem:[%s5112_s1 + $0x88] sm:$0xff]  ;;  %v697_v50 = vpack.c.bf16 %v261_v42, %v259_v41 }
  0x18   : > { %v266_v47 = vld [vmem:[%s5112_s1 + $0x98] sm:$0xff]  ;;  %v456_v48 = vld [vmem:[%s5112_s1 + $0x688] sm:$0xff]  ;;  %v793_v51 = vpack.c.bf16 %v453_v45, %v451_v44  ;;  %v263_v53 = vld [vmem:[%s5112_s1 + $0x80] sm:$0xff]  ;;  %s3578_s12 = scalar_lea.vmem %s5111_s0, %s2943_s5 }
  0x19   : > { %v458_v49 = vld [vmem:[%s5112_s1 + $0x698] sm:$0xff]  ;;  %1435 = vmatpush1.bf16.msra.mxu1 %v695_v34  ;;  %v700_v52 = vpack.c.bf16 %v266_v47, %v264_v46  ;;  %v265_v54 = vld [vmem:[%s5112_s1 + $0x90] sm:$0xff]  ;;  %v455_v55 = vld [vmem:[%s5112_s1 + $0x680] sm:$0xff] }
  0x1a   : > { %1714 = vmatpush1.bf16.msra.mxu0 %v791_v38  ;;  %1436 = vmatprep.subr.bf16.mxu1 %v698_v39  ;;  %v796_v56 = vpack.c.bf16 %v458_v49, %v456_v48  ;;  %v457_v57 = vld [vmem:[%s5112_s1 + $0x690] sm:$0xff]  ;;  %v268_v58 = vld [vmem:[%s5112_s1 + $0xa8] sm:$0xff]  ;;  %v270_v59 = vld [vmem:[%s5112_s1 + $0xb8] sm:$0xff]  ;;  %v699_v62 = vpack.c.bf16 %v265_v54, %v263_v53 }
  0x1b   : > { %1715 = vmatprep.subr.bf16.mxu0 %v794_v43  ;;  %v460_v60 = vld [vmem:[%s5112_s1 + $0x6a8] sm:$0xff]  ;;  %v462_v61 = vld [vmem:[%s5112_s1 + $0x6b8] sm:$0xff]  ;;  %v795_v63 = vpack.c.bf16 %v457_v57, %v455_v55  ;;  %v702_v0 = vpack.c.bf16 %v270_v59, %v268_v58  ;;  %v267_v1 = vld [vmem:[%s5112_s1 + $0xa0] sm:$0xff] }
  0x1c   : > { %v269_v2 = vld [vmem:[%s5112_s1 + $0xb0] sm:$0xff]  ;;  %v459_v3 = vld [vmem:[%s5112_s1 + $0x6a0] sm:$0xff]  ;;  %v798_v4 = vpack.c.bf16 %v462_v61, %v460_v60  ;;  %v272_v6 = vld [vmem:[%s5112_s1 + $0xc8] sm:$0xff] }
  0x1d   : > { %1437 = vmatpush1.bf16.msra.mxu1 %v697_v50  ;;  %v461_v5 = vld [vmem:[%s5112_s1 + $0x6b0] sm:$0xff]  ;;  %v274_v7 = vld [vmem:[%s5112_s1 + $0xd8] sm:$0xff]  ;;  %v464_v8 = vld [vmem:[%s5112_s1 + $0x6c8] sm:$0xff]  ;;  %v701_v10 = vpack.c.bf16 %v269_v2, %v267_v1 }
  0x1e   : > { %1716 = vmatpush1.bf16.msra.mxu0 %v793_v51  ;;  %1438 = vmatprep.subr.bf16.mxu1 %v700_v52  ;;  %v466_v9 = vld [vmem:[%s5112_s1 + $0x6d8] sm:$0xff]  ;;  %v797_v11 = vpack.c.bf16 %v461_v5, %v459_v3  ;;  %v704_v12 = vpack.c.bf16 %v274_v7, %v272_v6  ;;  %v271_v13 = vld [vmem:[%s5112_s1 + $0xc0] sm:$0xff]  ;;  %v273_v14 = vld [vmem:[%s5112_s1 + $0xd0] sm:$0xff] }
  0x1f   : > { %1717 = vmatprep.subr.bf16.mxu0 %v796_v56  ;;  %v463_v15 = vld [vmem:[%s5112_s1 + $0x6c0] sm:$0xff]  ;;  %v800_v16 = vpack.c.bf16 %v466_v9, %v464_v8  ;;  %v465_v17 = vld [vmem:[%s5112_s1 + $0x6d0] sm:$0xff]  ;;  %v276_v18 = vld [vmem:[%s5112_s1 + $0xe8] sm:$0xff]  ;;  %v703_v22 = vpack.c.bf16 %v273_v14, %v271_v13 }
  0x20   : > { %v278_v19 = vld [vmem:[%s5112_s1 + $0xf8] sm:$0xff]  ;;  %v468_v20 = vld [vmem:[%s5112_s1 + $0x6e8] sm:$0xff]  ;;  %v799_v23 = vpack.c.bf16 %v465_v17, %v463_v15  ;;  %v275_v25 = vld [vmem:[%s5112_s1 + $0xe0] sm:$0xff] }
  0x21   : > { %1439 = vmatpush1.bf16.msra.mxu1 %v699_v62  ;;  %v470_v21 = vld [vmem:[%s5112_s1 + $0x6f8] sm:$0xff]  ;;  %v706_v24 = vpack.c.bf16 %v278_v19, %v276_v18  ;;  %v277_v26 = vld [vmem:[%s5112_s1 + $0xf0] sm:$0xff]  ;;  %v467_v27 = vld [vmem:[%s5112_s1 + $0x6e0] sm:$0xff] }
  0x22   : > { %1718 = vmatpush1.bf16.msra.mxu0 %v795_v63  ;;  %1440 = vmatprep.subr.bf16.mxu1 %v702_v0  ;;  %v802_v28 = vpack.c.bf16 %v470_v21, %v468_v20  ;;  %v469_v29 = vld [vmem:[%s5112_s1 + $0x6f0] sm:$0xff]  ;;  %v280_v30 = vld [vmem:[%s5112_s1 + $0x108] sm:$0xff]  ;;  %v282_v31 = vld [vmem:[%s5112_s1 + $0x118] sm:$0xff]  ;;  %v705_v34 = vpack.c.bf16 %v277_v26, %v275_v25 }
  0x23   : > { %1719 = vmatprep.subr.bf16.mxu0 %v798_v4  ;;  %v472_v32 = vld [vmem:[%s5112_s1 + $0x708] sm:$0xff]  ;;  %v474_v33 = vld [vmem:[%s5112_s1 + $0x718] sm:$0xff]  ;;  %v801_v35 = vpack.c.bf16 %v469_v29, %v467_v27  ;;  %v708_v36 = vpack.c.bf16 %v282_v31, %v280_v30  ;;  %v279_v37 = vld [vmem:[%s5112_s1 + $0x100] sm:$0xff] }
  0x24   : > { %v281_v38 = vld [vmem:[%s5112_s1 + $0x110] sm:$0xff]  ;;  %v471_v39 = vld [vmem:[%s5112_s1 + $0x700] sm:$0xff]  ;;  %v804_v40 = vpack.c.bf16 %v474_v33, %v472_v32  ;;  %v284_v42 = vld [vmem:[%s5112_s1 + $0x128] sm:$0xff] }
  0x25   : > { %1441 = vmatpush1.bf16.msra.mxu1 %v701_v10  ;;  %v473_v41 = vld [vmem:[%s5112_s1 + $0x710] sm:$0xff]  ;;  %v286_v43 = vld [vmem:[%s5112_s1 + $0x138] sm:$0xff]  ;;  %v476_v44 = vld [vmem:[%s5112_s1 + $0x728] sm:$0xff]  ;;  %v707_v46 = vpack.c.bf16 %v281_v38, %v279_v37 }
  0x26   : > { %1720 = vmatpush1.bf16.msra.mxu0 %v797_v11  ;;  %1442 = vmatprep.subr.bf16.mxu1 %v704_v12  ;;  %v478_v45 = vld [vmem:[%s5112_s1 + $0x738] sm:$0xff]  ;;  %v803_v47 = vpack.c.bf16 %v473_v41, %v471_v39  ;;  %v710_v48 = vpack.c.bf16 %v286_v43, %v284_v42  ;;  %v283_v49 = vld [vmem:[%s5112_s1 + $0x120] sm:$0xff]  ;;  %v285_v50 = vld [vmem:[%s5112_s1 + $0x130] sm:$0xff] }
  0x27   : > { %1721 = vmatprep.subr.bf16.mxu0 %v800_v16  ;;  %v475_v51 = vld [vmem:[%s5112_s1 + $0x720] sm:$0xff]  ;;  %v806_v52 = vpack.c.bf16 %v478_v45, %v476_v44  ;;  %v477_v53 = vld [vmem:[%s5112_s1 + $0x730] sm:$0xff]  ;;  %v288_v54 = vld [vmem:[%s5112_s1 + $0x148] sm:$0xff]  ;;  %v709_v58 = vpack.c.bf16 %v285_v50, %v283_v49 }
  0x28   : > { %v290_v55 = vld [vmem:[%s5112_s1 + $0x158] sm:$0xff]  ;;  %v480_v56 = vld [vmem:[%s5112_s1 + $0x748] sm:$0xff]  ;;  %v805_v59 = vpack.c.bf16 %v477_v53, %v475_v51  ;;  %v287_v61 = vld [vmem:[%s5112_s1 + $0x140] sm:$0xff] }
  0x29   : > { %1443 = vmatpush1.bf16.msra.mxu1 %v703_v22  ;;  %v482_v57 = vld [vmem:[%s5112_s1 + $0x758] sm:$0xff]  ;;  %v712_v60 = vpack.c.bf16 %v290_v55, %v288_v54  ;;  %v289_v62 = vld [vmem:[%s5112_s1 + $0x150] sm:$0xff]  ;;  %v479_v63 = vld [vmem:[%s5112_s1 + $0x740] sm:$0xff] }
  0x2a   : > { %1722 = vmatpush1.bf16.msra.mxu0 %v799_v23  ;;  %1444 = vmatprep.subr.bf16.mxu1 %v706_v24  ;;  %v808_v0 = vpack.c.bf16 %v482_v57, %v480_v56  ;;  %v481_v1 = vld [vmem:[%s5112_s1 + $0x750] sm:$0xff]  ;;  %v292_v2 = vld [vmem:[%s5112_s1 + $0x168] sm:$0xff]  ;;  %v294_v3 = vld [vmem:[%s5112_s1 + $0x178] sm:$0xff]  ;;  %v711_v6 = vpack.c.bf16 %v289_v62, %v287_v61 }
  0x2b   : > { %1723 = vmatprep.subr.bf16.mxu0 %v802_v28  ;;  %v484_v4 = vld [vmem:[%s5112_s1 + $0x768] sm:$0xff]  ;;  %v486_v5 = vld [vmem:[%s5112_s1 + $0x778] sm:$0xff]  ;;  %v291_v7 = vld [vmem:[%s5112_s1 + $0x160] sm:$0xff]  ;;  %v807_v9 = vpack.c.bf16 %v481_v1, %v479_v63  ;;  %v714_v10 = vpack.c.bf16 %v294_v3, %v292_v2 }
  0x2c   : > { %v293_v8 = vld [vmem:[%s5112_s1 + $0x170] sm:$0xff]  ;;  %v483_v11 = vld [vmem:[%s5112_s1 + $0x760] sm:$0xff]  ;;  %v296_v13 = vld [vmem:[%s5112_s1 + $0x188] sm:$0xff]  ;;  %v810_v14 = vpack.c.bf16 %v486_v5, %v484_v4 }
  0x2d   : > { %1445 = vmatpush1.bf16.msra.mxu1 %v705_v34  ;;  %v485_v12 = vld [vmem:[%s5112_s1 + $0x770] sm:$0xff]  ;;  %v298_v15 = vld [vmem:[%s5112_s1 + $0x198] sm:$0xff]  ;;  %v488_v16 = vld [vmem:[%s5112_s1 + $0x788] sm:$0xff]  ;;  %v713_v19 = vpack.c.bf16 %v293_v8, %v291_v7 }
  0x2e   : > { %1724 = vmatpush1.bf16.msra.mxu0 %v801_v35  ;;  %1446 = vmatprep.subr.bf16.mxu1 %v708_v36  ;;  %v490_v17 = vld [vmem:[%s5112_s1 + $0x798] sm:$0xff]  ;;  %v295_v20 = vld [vmem:[%s5112_s1 + $0x180] sm:$0xff]  ;;  %v297_v21 = vld [vmem:[%s5112_s1 + $0x190] sm:$0xff]  ;;  %v809_v22 = vpack.c.bf16 %v485_v12, %v483_v11  ;;  %v716_v23 = vpack.c.bf16 %v298_v15, %v296_v13 }
  0x2f   : > { %1725 = vmatprep.subr.bf16.mxu0 %v804_v40  ;;  %v2990_v18 = vld [vmem:[%s3578_s12 + $0x4] ss:$56 sps:$4 sm:$0xff]   ;;  %v812_v26 = vpack.c.bf16 %v490_v17, %v488_v16  ;;  %v489_v27 = vld [vmem:[%s5112_s1 + $0x790] sm:$0xff]  ;;  %v300_v28 = vld [vmem:[%s5112_s1 + $0x1a8] sm:$0xff]  ;;  %v715_v32 = vpack.c.bf16 %v297_v21, %v295_v20 }
  0x30   : > { %v487_v24 = vld [vmem:[%s5112_s1 + $0x780] sm:$0xff]  ;;  %v2993_v25 = vld [vmem:[%s3578_s12 + $0x1c] ss:$56 sps:$4 sm:$0xff]   ;;  %1462 = vmatprep.mubr.bf16.mxu1 %v2990_v18  ;;  %v492_v30 = vld [vmem:[%s5112_s1 + $0x7a8] sm:$0xff] }
  0x31   : > { %1447 = vmatpush1.bf16.msra.mxu1 %v707_v46  ;;  %v302_v29 = vld [vmem:[%s5112_s1 + $0x1b8] sm:$0xff]  ;;  %1741 = vmatprep.mubr.bf16.mxu0 %v2993_v25  ;;  %v811_v33 = vpack.c.bf16 %v489_v27, %v487_v24  ;;  %v299_v35 = vld [vmem:[%s5112_s1 + $0x1a0] sm:$0xff]  ;;  %v301_v36 = vld [vmem:[%s5112_s1 + $0x1b0] sm:$0xff] }
  0x32   : > { %1726 = vmatpush1.bf16.msra.mxu0 %v803_v47  ;;  %1448 = vmatprep.subr.bf16.mxu1 %v710_v48  ;;  %v494_v31 = vld [vmem:[%s5112_s1 + $0x7b8] sm:$0xff]  ;;  %v718_v34 = vpack.c.bf16 %v302_v29, %v300_v28  ;;  %v491_v37 = vld [vmem:[%s5112_s1 + $0x7a0] sm:$0xff]  ;;  %v493_v39 = vld [vmem:[%s5112_s1 + $0x7b0] sm:$0xff]  ;;  %v717_v44 = vpack.c.bf16 %v301_v36, %v299_v35 }
  0x33   : > { %1727 = vmatprep.subr.bf16.mxu0 %v806_v52  ;;  %v814_v38 = vpack.c.bf16 %v494_v31, %v492_v30  ;;  %v304_v40 = vld [vmem:[%s5112_s1 + $0x1c8] sm:$0xff]  ;;  %v306_v41 = vld [vmem:[%s5112_s1 + $0x1d8] sm:$0xff]  ;;  %v813_v45 = vpack.c.bf16 %v493_v39, %v491_v37  ;;  %v303_v47 = vld [vmem:[%s5112_s1 + $0x1c0] sm:$0xff] }
  0x34   : > { %v496_v42 = vld [vmem:[%s5112_s1 + $0x7c8] sm:$0xff]  ;;  %v498_v43 = vld [vmem:[%s5112_s1 + $0x7d8] sm:$0xff]  ;;  %v720_v46 = vpack.c.bf16 %v306_v41, %v304_v40  ;;  %v305_v48 = vld [vmem:[%s5112_s1 + $0x1d0] sm:$0xff] }
  0x35   : > { %1449 = vmatpush1.bf16.msra.mxu1 %v709_v58  ;;  %v495_v49 = vld [vmem:[%s5112_s1 + $0x7c0] sm:$0xff]  ;;  %v816_v50 = vpack.c.bf16 %v498_v43, %v496_v42  ;;  %v497_v51 = vld [vmem:[%s5112_s1 + $0x7d0] sm:$0xff]  ;;  %v308_v52 = vld [vmem:[%s5112_s1 + $0x1e8] sm:$0xff]  ;;  %v719_v56 = vpack.c.bf16 %v305_v48, %v303_v47 }
  0x36   : > { %1728 = vmatpush1.bf16.msra.mxu0 %v805_v59  ;;  %1450 = vmatprep.subr.bf16.mxu1 %v712_v60  ;;  %v310_v53 = vld [vmem:[%s5112_s1 + $0x1f8] sm:$0xff]  ;;  %v500_v54 = vld [vmem:[%s5112_s1 + $0x7e8] sm:$0xff]  ;;  %v815_v57 = vpack.c.bf16 %v497_v51, %v495_v49  ;;  %v307_v59 = vld [vmem:[%s5112_s1 + $0x1e0] sm:$0xff] }
  0x37   : > { %1729 = vmatprep.subr.bf16.mxu0 %v808_v0  ;;  %v502_v55 = vld [vmem:[%s5112_s1 + $0x7f8] sm:$0xff]  ;;  %v722_v58 = vpack.c.bf16 %v310_v53, %v308_v52  ;;  %v309_v60 = vld [vmem:[%s5112_s1 + $0x1f0] sm:$0xff]  ;;  %v499_v61 = vld [vmem:[%s5112_s1 + $0x7e0] sm:$0xff] }
  0x38   : > { %v818_v62 = vpack.c.bf16 %v502_v55, %v500_v54  ;;  %v501_v63 = vld [vmem:[%s5112_s1 + $0x7f0] sm:$0xff]  ;;  %v312_v0 = vld [vmem:[%s5112_s1 + $0x208] sm:$0xff]  ;;  %v314_v1 = vld [vmem:[%s5112_s1 + $0x218] sm:$0xff]  ;;  %v721_v4 = vpack.c.bf16 %v309_v60, %v307_v59 }
  0x39   : > { %1451 = vmatpush1.bf16.msra.mxu1 %v711_v6  ;;  %v504_v2 = vld [vmem:[%s5112_s1 + $0x808] sm:$0xff]  ;;  %v506_v3 = vld [vmem:[%s5112_s1 + $0x818] sm:$0xff]  ;;  %v311_v5 = vld [vmem:[%s5112_s1 + $0x200] sm:$0xff]  ;;  %v817_v8 = vpack.c.bf16 %v501_v63, %v499_v61 }
  0x3a   : > { %1730 = vmatpush1.bf16.msra.mxu0 %v807_v9  ;;  %1452 = vmatprep.subr.bf16.mxu1 %v714_v10  ;;  %v313_v6 = vld [vmem:[%s5112_s1 + $0x210] sm:$0xff]  ;;  %v503_v7 = vld [vmem:[%s5112_s1 + $0x800] sm:$0xff]  ;;  %v724_v10 = vpack.c.bf16 %v314_v1, %v312_v0  ;;  %v820_v12 = vpack.c.bf16 %v506_v3, %v504_v2  ;;  %v316_v13 = vld [vmem:[%s5112_s1 + $0x228] sm:$0xff] }
  0x3b   : > { %1731 = vmatprep.subr.bf16.mxu0 %v810_v14  ;;  %v2988_v9 = vld [vmem:[%s3578_s12] ss:$56 sps:$4 sm:$0xff]   ;;  %v505_v11 = vld [vmem:[%s5112_s1 + $0x810] sm:$0xff]  ;;  %v508_v15 = vld [vmem:[%s5112_s1 + $0x828] sm:$0xff]  ;;  %v723_v18 = vpack.c.bf16 %v313_v6, %v311_v5 }
  0x3c   : > { %v318_v14 = vld [vmem:[%s5112_s1 + $0x238] sm:$0xff]  ;;  %v317_v20 = vld [vmem:[%s5112_s1 + $0x230] sm:$0xff]  ;;  %v819_v21 = vpack.c.bf16 %v505_v11, %v503_v7  ;;  %v320_v25 = vld [vmem:[%s5112_s1 + $0x248] sm:$0xff] }
  0x3d   : > { %1453 = vmatpush1.bf16.msra.mxu1 %v713_v19  ;;  %v510_v16 = vld [vmem:[%s5112_s1 + $0x838] sm:$0xff]  ;;  %v315_v19 = vld [vmem:[%s5112_s1 + $0x220] sm:$0xff]  ;;  %v509_v24 = vld [vmem:[%s5112_s1 + $0x830] sm:$0xff] }
  0x3e   : > { %1732 = vmatpush1.bf16.msra.mxu0 %v809_v22  ;;  %1454 = vmatprep.subr.bf16.mxu1 %v716_v23  ;;  %v2991_v17 = vld [vmem:[%s3578_s12 + $0x18] ss:$56 sps:$4 sm:$0xff]   ;;  %v726_v22 = vpack.c.bf16 %v318_v14, %v316_v13  ;;  %v507_v23 = vld [vmem:[%s5112_s1 + $0x820] sm:$0xff]  ;;  %v512_v28 = vld [vmem:[%s5112_s1 + $0x848] sm:$0xff] }
  0x3f   : > { %1733 = vmatprep.subr.bf16.mxu0 %v812_v26  ;;  %v822_v26 = vpack.c.bf16 %v510_v16, %v508_v15  ;;  %v322_v27 = vld [vmem:[%s5112_s1 + $0x258] sm:$0xff]  ;;  %v2994_v29 = vld [vmem:[%s3578_s12 + $0x74] ss:$56 sps:$4 sm:$0xff]   ;;  %v319_v31 = vld [vmem:[%s5112_s1 + $0x240] sm:$0xff]  ;;  %v821_v37 = vpack.c.bf16 %v509_v24, %v507_v23 }
  0x40   : > { %v514_v30 = vld [vmem:[%s5112_s1 + $0x858] sm:$0xff]  ;;  %v511_v35 = vld [vmem:[%s5112_s1 + $0x840] sm:$0xff]  ;;  %v513_v36 = vld [vmem:[%s5112_s1 + $0x850] sm:$0xff] }
  0x41   : > { %1455 = vmatpush1.bf16.msra.mxu1 %v715_v32  ;;  %v2996_v32 = vld [vmem:[%s3578_s12 + $0x8c] ss:$56 sps:$4 sm:$0xff]   ;;  %v824_v40 = vpack.c.bf16 %v514_v30, %v512_v28  ;;  %v326_v41 = vld [vmem:[%s5112_s1 + $0x278] sm:$0xff]  ;;  %v325_v47 = vld [vmem:[%s5112_s1 + $0x270] sm:$0xff]  ;;  %v823_v49 = vpack.c.bf16 %v513_v36, %v511_v35 }
  0x42   : > { %1734 = vmatpush1.bf16.msra.mxu0 %v811_v33  ;;  %1456 = vmatprep.subr.bf16.mxu1 %v718_v34  ;;  %v725_v33 = vpack.c.bf16 %v317_v20, %v315_v19  ;;  %v321_v34 = vld [vmem:[%s5112_s1 + $0x250] sm:$0xff]  ;;  %v324_v39 = vld [vmem:[%s5112_s1 + $0x268] sm:$0xff]  ;;  %v518_v43 = vld [vmem:[%s5112_s1 + $0x878] sm:$0xff] }
  0x43   : > { %1735 = vmatprep.subr.bf16.mxu0 %v814_v38  ;;  %v728_v38 = vpack.c.bf16 %v322_v27, %v320_v25  ;;  %v516_v42 = vld [vmem:[%s5112_s1 + $0x868] sm:$0xff]  ;;  %v515_v51 = vld [vmem:[%s5112_s1 + $0x860] sm:$0xff]  ;;  %v517_v52 = vld [vmem:[%s5112_s1 + $0x870] sm:$0xff] }
  0x44   : > { %v2999_v48 = vld [vmem:[%s3578_s12 + $0x88] ss:$56 sps:$4 sm:$0xff]   ;;  %v826_v54 = vpack.c.bf16 %v518_v43, %v516_v42  ;;  %v330_v55 = vld [vmem:[%s5112_s1 + $0x298] sm:$0xff]  ;;  %v521_v0 = vld [vmem:[%s5112_s1 + $0x890] sm:$0xff]  ;;  %v825_v1 = vpack.c.bf16 %v517_v52, %v515_v51 }
  0x45   : > { %1457 = vmatpush1.bf16.msra.mxu1 %v717_v44  ;;  %v2998_v44 = vld [vmem:[%s3578_s12 + $0x70] ss:$56 sps:$4 sm:$0xff]   ;;  %v327_v59 = vld [vmem:[%s5112_s1 + $0x280] sm:$0xff]  ;;  %v3002_v60 = vld [vmem:[%s3578_s12 + $0xfc] ss:$56 sps:$4 sm:$0xff]  }
  0x46   : > { %1736 = vmatpush1.bf16.msra.mxu0 %v813_v45  ;;  %1458 = vmatprep.subr.bf16.mxu1 %v720_v46  ;;  %v727_v45 = vpack.c.bf16 %v321_v34, %v319_v31  ;;  %v323_v46 = vld [vmem:[%s5112_s1 + $0x260] sm:$0xff]  ;;  %v328_v53 = vld [vmem:[%s5112_s1 + $0x288] sm:$0xff]  ;;  %v334_v5 = vld [vmem:[%s5112_s1 + $0x2b8] sm:$0xff] }
  0x47   : > { %1737 = vmatprep.subr.bf16.mxu0 %v816_v50  ;;  %v730_v50 = vpack.c.bf16 %v326_v41, %v324_v39  ;;  %v729_v61 = vpack.c.bf16 %v325_v47, %v323_v46  ;;  %v519_v63 = vld [vmem:[%s5112_s1 + $0x880] sm:$0xff]  ;;  %v732_v2 = vpack.c.bf16 %v330_v55, %v328_v53  ;;  %v332_v3 = vld [vmem:[%s5112_s1 + $0x2a8] sm:$0xff]  ;;  %v526_v7 = vld [vmem:[%s5112_s1 + $0x8b8] sm:$0xff] }
  0x48   : > { %v524_v6 = vld [vmem:[%s5112_s1 + $0x8a8] sm:$0xff]  ;;  %v333_v11 = vld [vmem:[%s5112_s1 + $0x2b0] sm:$0xff]  ;;  %v827_v13 = vpack.c.bf16 %v521_v0, %v519_v63  ;;  %v734_v14 = vpack.c.bf16 %v334_v5, %v332_v3  ;;  %v523_v15 = vld [vmem:[%s5112_s1 + $0x8a0] sm:$0xff] }
  0x49   : > { %1459 = vmatpush1.bf16.msra.mxu1 %v719_v56  ;;  %v520_v56 = vld [vmem:[%s5112_s1 + $0x888] sm:$0xff]  ;;  %v525_v16 = vld [vmem:[%s5112_s1 + $0x8b0] sm:$0xff]  ;;  %v338_v19 = vld [vmem:[%s5112_s1 + $0x2d8] sm:$0xff] }
  0x4a   : > { %1738 = vmatpush1.bf16.msra.mxu0 %v815_v57  ;;  %1460 = vmatprep.subr.bf16.mxu1 %v722_v58  ;;  %v3000_v57 = vld [vmem:[%s3578_s12 + $0xe4] ss:$56 sps:$4 sm:$0xff]   ;;  %v528_v20 = vld [vmem:[%s5112_s1 + $0x8c8] sm:$0xff]  ;;  %v529_v28 = vld [vmem:[%s5112_s1 + $0x8d0] sm:$0xff] }
  0x4b   : > { %1739 = vmatprep.subr.bf16.mxu0 %v818_v62  ;;  %v522_v58 = vld [vmem:[%s5112_s1 + $0x898] sm:$0xff]  ;;  %v329_v62 = vld [vmem:[%s5112_s1 + $0x290] sm:$0xff]  ;;  %v335_v23 = vld [vmem:[%s5112_s1 + $0x2c0] sm:$0xff] }
  0x4c   : > { %v3008_v24 = vld [vmem:[%s3578_s12 + $0x16c] ss:$56 sps:$4 sm:$0xff]   ;;  %v534_v35 = vld [vmem:[%s5112_s1 + $0x8f8] sm:$0xff]  ;;  %v3010_v36 = vld [vmem:[%s3578_s12 + $0x150] ss:$56 sps:$4 sm:$0xff]  }
  0x4d   : > { %1461 = vmatpush1.bf16.msra.mxu1 %v721_v4  ;;  %v828_v4 = vpack.c.bf16 %v522_v58, %v520_v56  ;;  %v527_v27 = vld [vmem:[%s5112_s1 + $0x8c0] sm:$0xff]  ;;  %v340_v31 = vld [vmem:[%s5112_s1 + $0x2e8] sm:$0xff]  ;;  %v341_v39 = vld [vmem:[%s5112_s1 + $0x2f0] sm:$0xff] }
  0x4e   : > { %1740 = vmatpush1.bf16.msra.mxu0 %v817_v8  ;;  %1523 = vmatprep.subr.bf16.mxu1 %v724_v10  ;;  %v3004_v8 = vld [vmem:[%s3578_s12 + $0xe0] ss:$56 sps:$4 sm:$0xff]   ;;  %v532_v34 = vld [vmem:[%s5112_s1 + $0x8e8] sm:$0xff]  ;;  %v831_v41 = vpack.c.bf16 %v529_v28, %v527_v27  ;;  %v3014_v52 = vld [vmem:[%s3578_s12 + $0x1dc] ss:$56 sps:$4 sm:$0xff]  }
  0x4f   : > { %1802 = vmatprep.subr.bf16.mxu0 %v820_v12  ;;  %v331_v10 = vld [vmem:[%s5112_s1 + $0x2a0] sm:$0xff]  ;;  %v3005_v12 = vld [vmem:[%s3578_s12 + $0xf8] ss:$56 sps:$4 sm:$0xff]   ;;  %v834_v46 = vpack.c.bf16 %v534_v35, %v532_v34 }
  0x50   : > { %1463 = vmatmul.mubr.bf16.vlgmr.msra.gmra.mrb[0].mxu1 %v2988_v9  ;;  %v731_v9 = vpack.c.bf16 %v329_v62, %v327_v59  ;;  %v733_v25 = vpack.c.bf16 %v333_v11, %v331_v10  ;;  %v531_v43 = vld [vmem:[%s5112_s1 + $0x8e0] sm:$0xff]  ;;  %v346_v47 = vld [vmem:[%s5112_s1 + $0x318] sm:$0xff]  ;;  %v537_v56 = vld [vmem:[%s5112_s1 + $0x910] sm:$0xff] }
  0x51   : > { %1524 = vmatpush1.bf16.msra.mxu1 %v723_v18  ;;  %1742 = vmatmul.mubr.bf16.vlgmr.msra.gmra.mrb[0].mxu0 %v2991_v17  ;;  %v336_v17 = vld [vmem:[%s5112_s1 + $0x2c8] sm:$0xff]  ;;  %v830_v18 = vpack.c.bf16 %v526_v7, %v524_v6  ;;  %v343_v51 = vld [vmem:[%s5112_s1 + $0x300] sm:$0xff]  ;;  %v542_v63 = vld [vmem:[%s5112_s1 + $0x938] sm:$0xff] }
  0x52   : > { %1803 = vmatpush1.bf16.msra.mxu0 %v819_v21  ;;  %1525 = vmatprep.subr.bf16.mxu1 %v726_v22  ;;  %v3006_v21 = vld [vmem:[%s3578_s12 + $0x154] ss:$56 sps:$4 sm:$0xff]   ;;  %v530_v22 = vld [vmem:[%s5112_s1 + $0x8d8] sm:$0xff]  ;;  %v736_v30 = vpack.c.bf16 %v338_v19, %v336_v17  ;;  %v535_v55 = vld [vmem:[%s5112_s1 + $0x900] sm:$0xff] }
  0x53   : > { %1804 = vmatprep.subr.bf16.mxu0 %v822_v26  ;;  %1472 = vmatprep.mubr.bf16.mxu1 %v2994_v29  ;;  %v337_v26 = vld [vmem:[%s5112_s1 + $0x2d0] sm:$0xff]  ;;  %v829_v29 = vpack.c.bf16 %v525_v16, %v523_v15  ;;  %v348_v59 = vld [vmem:[%s5112_s1 + $0x328] sm:$0xff]  ;;  %v3016_v0 = vld [vmem:[%s3578_s12 + $0x1c0] ss:$56 sps:$4 sm:$0xff]   ;;  %v835_v5 = vpack.c.bf16 %v537_v56, %v535_v55 }
  0x54   : > { %1751 = vmatprep.mubr.bf16.mxu0 %v2996_v32  ;;  %v832_v32 = vpack.c.bf16 %v530_v22, %v528_v20  ;;  %v540_v62 = vld [vmem:[%s5112_s1 + $0x928] sm:$0xff]  ;;  %v349_v3 = vld [vmem:[%s5112_s1 + $0x330] sm:$0xff]  ;;  %v539_v7 = vld [vmem:[%s5112_s1 + $0x920] sm:$0xff] }
  0x55   : > { %1526 = vmatpush1.bf16.msra.mxu1 %v725_v33  ;;  %v342_v33 = vld [vmem:[%s5112_s1 + $0x2f8] sm:$0xff]  ;;  %v838_v10 = vpack.c.bf16 %v542_v63, %v540_v62  ;;  %v351_v15 = vld [vmem:[%s5112_s1 + $0x340] sm:$0xff]  ;;  %v545_v20 = vld [vmem:[%s5112_s1 + $0x950] sm:$0xff] }
  0x56   : > { %1805 = vmatpush1.bf16.msra.mxu0 %v821_v37  ;;  %1527 = vmatprep.subr.bf16.mxu1 %v728_v38  ;;  %v735_v37 = vpack.c.bf16 %v337_v26, %v335_v23  ;;  %v339_v38 = vld [vmem:[%s5112_s1 + $0x2e0] sm:$0xff]  ;;  %v738_v42 = vpack.c.bf16 %v342_v33, %v340_v31  ;;  %v354_v11 = vld [vmem:[%s5112_s1 + $0x358] sm:$0xff]  ;;  %v356_v23 = vld [vmem:[%s5112_s1 + $0x368] sm:$0xff] }
  0x57   : > { %1806 = vmatprep.subr.bf16.mxu0 %v824_v40  ;;  %v3011_v40 = vld [vmem:[%s3578_s12 + $0x168] ss:$56 sps:$4 sm:$0xff]   ;;  %v737_v53 = vpack.c.bf16 %v341_v39, %v339_v38  ;;  %v3020_v16 = vld [vmem:[%s3578_s12 + $0x24c] ss:$56 sps:$4 sm:$0xff]   ;;  %v550_v27 = vld [vmem:[%s5112_s1 + $0x978] sm:$0xff] }
  0x58   : > { %1473 = vmatmul.mubr.bf16.gmra.mrb[4].mxu1 %v2998_v44  ;;  %v533_v44 = vld [vmem:[%s5112_s1 + $0x8f0] sm:$0xff]  ;;  %v543_v19 = vld [vmem:[%s5112_s1 + $0x940] sm:$0xff]  ;;  %v548_v26 = vld [vmem:[%s5112_s1 + $0x968] sm:$0xff] }
  0x59   : > { %1528 = vmatpush1.bf16.msra.mxu1 %v727_v45  ;;  %1752 = vmatmul.mubr.bf16.gmra.mrb[4].mxu0 %v2999_v48  ;;  %v344_v45 = vld [vmem:[%s5112_s1 + $0x308] sm:$0xff]  ;;  %v357_v34 = vld [vmem:[%s5112_s1 + $0x370] sm:$0xff]  ;;  %v547_v35 = vld [vmem:[%s5112_s1 + $0x960] sm:$0xff] }
  0x5a   : > { %1807 = vmatpush1.bf16.msra.mxu0 %v823_v49  ;;  %1529 = vmatprep.subr.bf16.mxu1 %v730_v50  ;;  %v536_v48 = vld [vmem:[%s5112_s1 + $0x908] sm:$0xff]  ;;  %v3012_v49 = vld [vmem:[%s3578_s12 + $0x1c4] ss:$56 sps:$4 sm:$0xff]   ;;  %v740_v58 = vpack.c.bf16 %v346_v47, %v344_v45  ;;  %v557_v63 = vld [vmem:[%s5112_s1 + $0x9b0] sm:$0xff] }
  0x5b   : > { %1808 = vmatprep.subr.bf16.mxu0 %v826_v54  ;;  %1482 = vmatprep.mubr.bf16.mxu1 %v3000_v57  ;;  %v538_v50 = vld [vmem:[%s5112_s1 + $0x918] sm:$0xff]  ;;  %v345_v54 = vld [vmem:[%s5112_s1 + $0x310] sm:$0xff]  ;;  %v833_v57 = vpack.c.bf16 %v533_v44, %v531_v43  ;;  %v3023_v31 = vld [vmem:[%s3578_s12 + $0x248] ss:$56 sps:$4 sm:$0xff]  }
  0x5c   : > { %1761 = vmatprep.mubr.bf16.mxu0 %v3002_v60  ;;  %v836_v60 = vpack.c.bf16 %v538_v50, %v536_v48  ;;  %v3022_v28 = vld [vmem:[%s3578_s12 + $0x230] ss:$56 sps:$4 sm:$0xff]   ;;  %v362_v39 = vld [vmem:[%s5112_s1 + $0x398] sm:$0xff]  ;;  %v359_v47 = vld [vmem:[%s5112_s1 + $0x380] sm:$0xff] }
  0x5d   : > { %1530 = vmatpush1.bf16.msra.mxu1 %v729_v61  ;;  %v350_v61 = vld [vmem:[%s5112_s1 + $0x338] sm:$0xff]  ;;  %v360_v38 = vld [vmem:[%s5112_s1 + $0x388] sm:$0xff]  ;;  %v361_v48 = vld [vmem:[%s5112_s1 + $0x390] sm:$0xff] }
  0x5e   : > { %1809 = vmatpush1.bf16.msra.mxu0 %v825_v1  ;;  %1531 = vmatprep.subr.bf16.mxu1 %v732_v2  ;;  %v739_v1 = vpack.c.bf16 %v345_v54, %v343_v51  ;;  %v347_v2 = vld [vmem:[%s5112_s1 + $0x320] sm:$0xff]  ;;  %v742_v6 = vpack.c.bf16 %v350_v61, %v348_v59  ;;  %v553_v51 = vld [vmem:[%s5112_s1 + $0x990] sm:$0xff]  ;;  %v556_v54 = vld [vmem:[%s5112_s1 + $0x9a8] sm:$0xff]  ;;  %v747_v56 = vpack.c.bf16 %v361_v48, %v359_v47 }
  0x5f   : > { %1810 = vmatprep.subr.bf16.mxu0 %v828_v4  ;;  %v3017_v4 = vld [vmem:[%s3578_s12 + $0x1d8] ss:$56 sps:$4 sm:$0xff]   ;;  %v741_v17 = vpack.c.bf16 %v349_v3, %v347_v2  ;;  %v3029_v43 = vld [vmem:[%s3578_s12 + $0x24] ss:$56 sps:$4 sm:$0xff]   ;;  %v560_v2 = vld [vmem:[%s5112_s1 + $0x9c8] sm:$0xff] }
  0x60   : > { %1483 = vmatmul.mubr.bf16.gmra.mrb[8].mxu1 %v3004_v8  ;;  %v541_v8 = vld [vmem:[%s5112_s1 + $0x930] sm:$0xff]  ;;  %v558_v55 = vld [vmem:[%s5112_s1 + $0x9b8] sm:$0xff]  ;;  %v363_v59 = vld [vmem:[%s5112_s1 + $0x3a0] sm:$0xff] }
  0x61   : > { %1532 = vmatpush1.bf16.msra.mxu1 %v731_v9  ;;  %1762 = vmatmul.mubr.bf16.gmra.mrb[8].mxu0 %v3005_v12  ;;  %v352_v9 = vld [vmem:[%s5112_s1 + $0x348] sm:$0xff]  ;;  %v555_v61 = vld [vmem:[%s5112_s1 + $0x9a0] sm:$0xff]  ;;  %v846_v62 = vpack.c.bf16 %v558_v55, %v556_v54  ;;  %v562_v3 = vld [vmem:[%s5112_s1 + $0x9d8] sm:$0xff] }
  0x62   : > { %1811 = vmatpush1.bf16.msra.mxu0 %v827_v13  ;;  %1533 = vmatprep.subr.bf16.mxu1 %v734_v14  ;;  %v544_v12 = vld [vmem:[%s5112_s1 + $0x948] sm:$0xff]  ;;  %v546_v14 = vld [vmem:[%s5112_s1 + $0x958] sm:$0xff]  ;;  %v744_v22 = vpack.c.bf16 %v354_v11, %v352_v9  ;;  %v559_v9 = vld [vmem:[%s5112_s1 + $0x9c0] sm:$0xff] }
  0x63   : > { %1812 = vmatprep.subr.bf16.mxu0 %v830_v18  ;;  %1492 = vmatprep.mubr.bf16.mxu1 %v3006_v21  ;;  %v3018_v13 = vld [vmem:[%s3578_s12 + $0x234] ss:$56 sps:$4 sm:$0xff]   ;;  %v837_v21 = vpack.c.bf16 %v541_v8, %v539_v7  ;;  %v367_v7 = vld [vmem:[%s5112_s1 + $0x3c0] sm:$0xff]  ;;  %v578_v54 = vld [vmem:[%s5112_s1 + $0xa58] sm:$0xff] }
  0x64   : > { %1771 = vmatprep.mubr.bf16.mxu0 %v3008_v24  ;;  %v353_v18 = vld [vmem:[%s5112_s1 + $0x350] sm:$0xff]  ;;  %v840_v24 = vpack.c.bf16 %v546_v14, %v544_v12  ;;  %v372_v12 = vld [vmem:[%s5112_s1 + $0x3e8] sm:$0xff] }
  0x65   : > { %1534 = vmatpush1.bf16.msra.mxu1 %v733_v25  ;;  %v358_v25 = vld [vmem:[%s5112_s1 + $0x378] sm:$0xff]  ;;  %v369_v8 = vld [vmem:[%s5112_s1 + $0x3d0] sm:$0xff]  ;;  %v564_v14 = vld [vmem:[%s5112_s1 + $0x9e8] sm:$0xff] }
  0x66   : > { %1813 = vmatpush1.bf16.msra.mxu0 %v829_v29  ;;  %1535 = vmatprep.subr.bf16.mxu1 %v736_v30  ;;  %v743_v29 = vpack.c.bf16 %v353_v18, %v351_v15  ;;  %v355_v30 = vld [vmem:[%s5112_s1 + $0x360] sm:$0xff]  ;;  %v746_v33 = vpack.c.bf16 %v358_v25, %v356_v23  ;;  %v561_v11 = vld [vmem:[%s5112_s1 + $0x9d0] sm:$0xff]  ;;  %v566_v15 = vld [vmem:[%s5112_s1 + $0x9f8] sm:$0xff] }
  0x67   : > { %1814 = vmatprep.subr.bf16.mxu0 %v832_v32  ;;  %v839_v32 = vpack.c.bf16 %v545_v20, %v543_v19  ;;  %v745_v44 = vpack.c.bf16 %v357_v34, %v355_v30  ;;  %v373_v18 = vld [vmem:[%s5112_s1 + $0x3f0] sm:$0xff]  ;;  %v847_v19 = vpack.c.bf16 %v561_v11, %v559_v9  ;;  %v378_v25 = vld [vmem:[%s5112_s1 + $0x418] sm:$0xff]  ;;  %v567_v34 = vld [vmem:[%s5112_s1 + $0xa00] sm:$0xff] }
  0x68   : > { %1493 = vmatmul.mubr.bf16.gmra.mrb[12].mxu1 %v3010_v36  ;;  %v549_v36 = vld [vmem:[%s5112_s1 + $0x970] sm:$0xff] }
  0x69   : > { %1536 = vmatpush1.bf16.msra.mxu1 %v735_v37  ;;  %1772 = vmatmul.mubr.bf16.gmra.mrb[12].mxu0 %v3011_v40  ;;  %v842_v37 = vpack.c.bf16 %v550_v27, %v548_v26  ;;  %v3026_v40 = vld [vmem:[%s3578_s12 + $0xc] ss:$56 sps:$4 sm:$0xff]   ;;  %v841_v45 = vpack.c.bf16 %v549_v36, %v547_v35  ;;  %v565_v23 = vld [vmem:[%s5112_s1 + $0x9f0] sm:$0xff]  ;;  %v570_v27 = vld [vmem:[%s5112_s1 + $0xa18] sm:$0xff] }
  0x6a   : > { %1815 = vmatpush1.bf16.msra.mxu0 %v831_v41  ;;  %1537 = vmatprep.subr.bf16.mxu1 %v738_v42  ;;  %v552_v41 = vld [vmem:[%s5112_s1 + $0x988] sm:$0xff]  ;;  %v554_v42 = vld [vmem:[%s5112_s1 + $0x998] sm:$0xff]  ;;  %v569_v35 = vld [vmem:[%s5112_s1 + $0xa10] sm:$0xff] }
  0x6b   : > { %1816 = vmatprep.subr.bf16.mxu0 %v834_v46  ;;  %1502 = vmatprep.mubr.bf16.mxu1 %v3012_v49  ;;  %v748_v46 = vpack.c.bf16 %v362_v39, %v360_v38  ;;  %v551_v49 = vld [vmem:[%s5112_s1 + $0x980] sm:$0xff]  ;;  %v844_v50 = vpack.c.bf16 %v554_v42, %v552_v41  ;;  %v568_v26 = vld [vmem:[%s5112_s1 + $0xa08] sm:$0xff]  ;;  %v382_v39 = vld [vmem:[%s5112_s1 + $0x438] sm:$0xff] }
  0x6c   : > { %1781 = vmatprep.mubr.bf16.mxu0 %v3014_v52  ;;  %v364_v52 = vld [vmem:[%s5112_s1 + $0x3a8] sm:$0xff]  ;;  %v3027_v36 = vld [vmem:[%s3578_s12 + $0x20] ss:$56 sps:$4 sm:$0xff]   ;;  %v573_v48 = vld [vmem:[%s5112_s1 + $0xa30] sm:$0xff] }
  0x6d   : > { %1538 = vmatpush1.bf16.msra.mxu1 %v737_v53  ;;  %v366_v53 = vld [vmem:[%s5112_s1 + $0x3b8] sm:$0xff]  ;;  %v380_v38 = vld [vmem:[%s5112_s1 + $0x428] sm:$0xff]  ;;  %v379_v42 = vld [vmem:[%s5112_s1 + $0x420] sm:$0xff] }
  0x6e   : > { %1817 = vmatpush1.bf16.msra.mxu0 %v833_v57  ;;  %1539 = vmatprep.subr.bf16.mxu1 %v740_v58  ;;  %v843_v57 = vpack.c.bf16 %v553_v51, %v551_v49  ;;  %v750_v58 = vpack.c.bf16 %v366_v53, %v364_v52  ;;  %v574_v41 = vld [vmem:[%s5112_s1 + $0xa38] sm:$0xff]  ;;  %v758_v47 = vpack.c.bf16 %v382_v39, %v380_v38  ;;  %v576_v53 = vld [vmem:[%s5112_s1 + $0xa48] sm:$0xff] }
  0x6f   : > { %1818 = vmatprep.subr.bf16.mxu0 %v836_v60  ;;  %v365_v60 = vld [vmem:[%s5112_s1 + $0x3b0] sm:$0xff]  ;;  %v386_v51 = vld [vmem:[%s5112_s1 + $0x458] sm:$0xff] }
  0x70   : > { %1503 = vmatmul.mubr.bf16.gmra.mrb[16].mxu1 %v3016_v0  ;;  %v368_v0 = vld [vmem:[%s5112_s1 + $0x3c8] sm:$0xff]  ;;  %v3030_v52 = vld [vmem:[%s3578_s12 + $0x7c] ss:$56 sps:$4 sm:$0xff]  }
  0x71   : > { %1540 = vmatpush1.bf16.msra.mxu1 %v739_v1  ;;  %1782 = vmatmul.mubr.bf16.gmra.mrb[16].mxu0 %v3017_v4  ;;  %v370_v1 = vld [vmem:[%s5112_s1 + $0x3d8] sm:$0xff]  ;;  %v749_v4 = vpack.c.bf16 %v365_v60, %v363_v59  ;;  %v3032_v55 = vld [vmem:[%s3578_s12 + $0x94] ss:$56 sps:$4 sm:$0xff]   ;;  %v3035_v9 = vld [vmem:[%s3578_s12 + $0x90] ss:$56 sps:$4 sm:$0xff]  }
  0x72   : > { %1819 = vmatpush1.bf16.msra.mxu0 %v835_v5  ;;  %1541 = vmatprep.subr.bf16.mxu1 %v742_v6  ;;  %v845_v5 = vpack.c.bf16 %v557_v63, %v555_v61  ;;  %v752_v6 = vpack.c.bf16 %v370_v1, %v368_v0  ;;  %v575_v61 = vld [vmem:[%s5112_s1 + $0xa40] sm:$0xff]  ;;  %v388_v63 = vld [vmem:[%s5112_s1 + $0x468] sm:$0xff]  ;;  %v856_v0 = vpack.c.bf16 %v578_v54, %v576_v53  ;;  %v390_v1 = vld [vmem:[%s5112_s1 + $0x478] sm:$0xff] }
  0x73   : > { %1820 = vmatprep.subr.bf16.mxu0 %v838_v10  ;;  %1512 = vmatprep.mubr.bf16.mxu1 %v3018_v13  ;;  %v848_v10 = vpack.c.bf16 %v562_v3, %v560_v2  ;;  %v374_v13 = vld [vmem:[%s5112_s1 + $0x3f8] sm:$0xff]  ;;  %v580_v2 = vld [vmem:[%s5112_s1 + $0xa68] sm:$0xff]  ;;  %v762_v11 = vpack.c.bf16 %v390_v1, %v388_v63  ;;  %v591_v53 = vld [vmem:[%s5112_s1 + $0xac0] sm:$0xff] }
  0x74   : > { %1791 = vmatprep.mubr.bf16.mxu0 %v3020_v16  ;;  %v371_v16 = vld [vmem:[%s5112_s1 + $0x3e0] sm:$0xff]  ;;  %v754_v20 = vpack.c.bf16 %v374_v13, %v372_v12  ;;  %v582_v3 = vld [vmem:[%s5112_s1 + $0xa78] sm:$0xff]  ;;  %v581_v12 = vld [vmem:[%s5112_s1 + $0xa70] sm:$0xff] }
  0x75   : > { %1542 = vmatpush1.bf16.msra.mxu1 %v741_v17  ;;  %v751_v17 = vpack.c.bf16 %v369_v8, %v367_v7  ;;  %v579_v8 = vld [vmem:[%s5112_s1 + $0xa60] sm:$0xff]  ;;  %v858_v13 = vpack.c.bf16 %v582_v3, %v580_v2  ;;  %v593_v54 = vld [vmem:[%s5112_s1 + $0xad0] sm:$0xff] }
  0x76   : > { %1821 = vmatpush1.bf16.msra.mxu0 %v837_v21  ;;  %1543 = vmatprep.subr.bf16.mxu1 %v744_v22  ;;  %v563_v21 = vld [vmem:[%s5112_s1 + $0x9e0] sm:$0xff]  ;;  %v850_v22 = vpack.c.bf16 %v566_v15, %v564_v14  ;;  %v392_v14 = vld [vmem:[%s5112_s1 + $0x488] sm:$0xff]  ;;  %v394_v15 = vld [vmem:[%s5112_s1 + $0x498] sm:$0xff]  ;;  %v863_v2 = vpack.c.bf16 %v593_v54, %v591_v53 }
  0x77   : > { %1822 = vmatprep.subr.bf16.mxu0 %v840_v24  ;;  %v376_v24 = vld [vmem:[%s5112_s1 + $0x408] sm:$0xff]  ;;  %v849_v30 = vpack.c.bf16 %v565_v23, %v563_v21  ;;  %v391_v21 = vld [vmem:[%s5112_s1 + $0x480] sm:$0xff]  ;;  %v857_v23 = vpack.c.bf16 %v581_v12, %v579_v8  ;;  %v421_v53 = vld [vmem:[%s5112_s1 + $0x570] sm:$0xff] }
  0x78   : > { %1513 = vmatmul.mubr.bf16.gmra.mrb[20].mxu1 %v3022_v28  ;;  %v753_v28 = vpack.c.bf16 %v373_v18, %v371_v16  ;;  %v3036_v16 = vld [vmem:[%s3578_s12 + $0xec] ss:$56 sps:$4 sm:$0xff]   ;;  %v586_v18 = vld [vmem:[%s5112_s1 + $0xa98] sm:$0xff]  ;;  %v3047_v1 = vld [vmem:[%s3578_s12 + $0x170] ss:$56 sps:$4 sm:$0xff]  }
  0x79   : > { %1544 = vmatpush1.bf16.msra.mxu1 %v743_v29  ;;  %1792 = vmatmul.mubr.bf16.gmra.mrb[20].mxu0 %v3023_v31  ;;  %v375_v29 = vld [vmem:[%s5112_s1 + $0x400] sm:$0xff]  ;;  %v3058_v54 = vld [vmem:[%s3578_s12 + $0x238] ss:$56 sps:$4 sm:$0xff]  }
  0x7a   : > { %1823 = vmatpush1.bf16.msra.mxu0 %v839_v32  ;;  %1545 = vmatprep.subr.bf16.mxu1 %v746_v33  ;;  %v3024_v31 = vld [vmem:[%s3578_s12 + $0x8] ss:$56 sps:$4 sm:$0xff]   ;;  %v756_v32 = vpack.c.bf16 %v378_v25, %v376_v24  ;;  %v377_v33 = vld [vmem:[%s5112_s1 + $0x410] sm:$0xff]  ;;  %v764_v24 = vpack.c.bf16 %v394_v15, %v392_v14  ;;  %v3048_v8 = vld [vmem:[%s3578_s12 + $0x1cc] ss:$56 sps:$4 sm:$0xff]  }
  0x7b   : > { %1824 = vmatprep.subr.bf16.mxu0 %v842_v37  ;;  %1555 = vmatprep.mubr.bf16.mxu1 %v3026_v40  ;;  %v852_v37 = vpack.c.bf16 %v570_v27, %v568_v26  ;;  %v572_v40 = vld [vmem:[%s5112_s1 + $0xa28] sm:$0xff]  ;;  %v583_v25 = vld [vmem:[%s5112_s1 + $0xa80] sm:$0xff]  ;;  %v585_v26 = vld [vmem:[%s5112_s1 + $0xa90] sm:$0xff] }
  0x7c   : > { %1834 = vmatprep.mubr.bf16.mxu0 %v3029_v43  ;;  %v381_v43 = vld [vmem:[%s5112_s1 + $0x430] sm:$0xff]  ;;  %v854_v49 = vpack.c.bf16 %v574_v41, %v572_v40  ;;  %v396_v27 = vld [vmem:[%s5112_s1 + $0x4a8] sm:$0xff]  ;;  %v859_v38 = vpack.c.bf16 %v585_v26, %v583_v25 }
  0x7d   : > { %1546 = vmatpush1.bf16.msra.mxu1 %v745_v44  ;;  %v755_v44 = vpack.c.bf16 %v377_v33, %v375_v29  ;;  %v398_v29 = vld [vmem:[%s5112_s1 + $0x4b8] sm:$0xff]  ;;  %v397_v33 = vld [vmem:[%s5112_s1 + $0x4b0] sm:$0xff]  ;;  %v3052_v26 = vld [vmem:[%s3578_s12 + $0x1c8] ss:$56 sps:$4 sm:$0xff]  }
  0x7e   : > { %1825 = vmatpush1.bf16.msra.mxu0 %v841_v45  ;;  %1547 = vmatprep.subr.bf16.mxu1 %v748_v46  ;;  %v571_v45 = vld [vmem:[%s5112_s1 + $0xa20] sm:$0xff]  ;;  %v851_v46 = vpack.c.bf16 %v569_v35, %v567_v34  ;;  %v766_v39 = vpack.c.bf16 %v398_v29, %v396_v27  ;;  %v589_v40 = vld [vmem:[%s5112_s1 + $0xab0] sm:$0xff] }
  0x7f   : > { %1826 = vmatprep.subr.bf16.mxu0 %v844_v50  ;;  %v384_v50 = vld [vmem:[%s5112_s1 + $0x448] sm:$0xff]  ;;  %v853_v59 = vpack.c.bf16 %v573_v48, %v571_v45  ;;  %v409_v14 = vld [vmem:[%s5112_s1 + $0x510] sm:$0xff] }
  0x80   : > { %v760_v60 = vpack.c.bf16 %v386_v51, %v384_v50  ;;  %v3040_v34 = vld [vmem:[%s3578_s12 + $0xe8] ss:$56 sps:$4 sm:$0xff]   ;;  %v401_v50 = vld [vmem:[%s5112_s1 + $0x4d0] sm:$0xff] }
  0x81   : > { %1548 = vmatpush1.bf16.msra.mxu1 %v747_v56  ;;  %v757_v56 = vpack.c.bf16 %v381_v43, %v379_v42  ;;  %v400_v42 = vld [vmem:[%s5112_s1 + $0x4c8] sm:$0xff]  ;;  %v402_v43 = vld [vmem:[%s5112_s1 + $0x4d8] sm:$0xff]  ;;  %v413_v25 = vld [vmem:[%s5112_s1 + $0x530] sm:$0xff] }
  0x82   : > { %1827 = vmatpush1.bf16.msra.mxu0 %v843_v57  ;;  %1549 = vmatprep.subr.bf16.mxu1 %v750_v58  ;;  %v383_v57 = vld [vmem:[%s5112_s1 + $0x440] sm:$0xff]  ;;  %v385_v58 = vld [vmem:[%s5112_s1 + $0x450] sm:$0xff]  ;;  %v592_v45 = vld [vmem:[%s5112_s1 + $0xac8] sm:$0xff] }
  0x83   : > { %1828 = vmatprep.subr.bf16.mxu0 %v846_v62  ;;  %v577_v62 = vld [vmem:[%s5112_s1 + $0xa50] sm:$0xff]  ;;  %v759_v7 = vpack.c.bf16 %v385_v58, %v383_v57  ;;  %v406_v57 = vld [vmem:[%s5112_s1 + $0x4f8] sm:$0xff]  ;;  %v596_v58 = vld [vmem:[%s5112_s1 + $0xae8] sm:$0xff] }
  0x84   : > { %v605_v29 = vld [vmem:[%s5112_s1 + $0xb30] sm:$0xff] }
  0x85   : > { %1550 = vmatpush1.bf16.msra.mxu1 %v749_v4  ;;  %v387_v4 = vld [vmem:[%s5112_s1 + $0x460] sm:$0xff] }
  0x86   : > { %1829 = vmatpush1.bf16.msra.mxu0 %v845_v5  ;;  %1551 = vmatprep.subr.bf16.mxu1 %v752_v6  ;;  %v389_v5 = vld [vmem:[%s5112_s1 + $0x470] sm:$0xff] }
  0x87   : > { %1830 = vmatprep.subr.bf16.mxu0 %v848_v10  ;;  %v3034_v6 = vld [vmem:[%s3578_s12 + $0x78] ss:$56 sps:$4 sm:$0xff]   ;;  %v855_v10 = vpack.c.bf16 %v577_v62, %v575_v61 }
  0x88   : > { %v405_v61 = vld [vmem:[%s5112_s1 + $0x4f0] sm:$0xff] }
  0x89   : > { %1552 = vmatpush1.bf16.msra.mxu1 %v751_v17  ;;  %v584_v17 = vld [vmem:[%s5112_s1 + $0xa88] sm:$0xff]  ;;  %v3046_v62 = vld [vmem:[%s3578_s12 + $0x158] ss:$56 sps:$4 sm:$0xff]  }
  0x8a   : > { %1831 = vmatpush1.bf16.msra.mxu0 %v847_v19  ;;  %1553 = vmatprep.subr.bf16.mxu1 %v754_v20  ;;  %v3038_v19 = vld [vmem:[%s3578_s12 + $0x104] ss:$56 sps:$4 sm:$0xff]   ;;  %v761_v20 = vpack.c.bf16 %v389_v5, %v387_v4  ;;  %v597_v4 = vld [vmem:[%s5112_s1 + $0xaf0] sm:$0xff] }
  0x8b   : > { %1832 = vmatprep.subr.bf16.mxu0 %v850_v22  ;;  %v393_v22 = vld [vmem:[%s5112_s1 + $0x490] sm:$0xff] }
  0x8c   : > { %v763_v35 = vpack.c.bf16 %v393_v22, %v391_v21  ;;  %v414_v21 = vld [vmem:[%s5112_s1 + $0x538] sm:$0xff]  ;;  %v604_v22 = vld [vmem:[%s5112_s1 + $0xb28] sm:$0xff] }
  0x8d   : > { %1554 = vmatpush1.bf16.msra.mxu1 %v753_v28  ;;  %v860_v28 = vpack.c.bf16 %v586_v18, %v584_v17  ;;  %v599_v17 = vld [vmem:[%s5112_s1 + $0xb00] sm:$0xff]  ;;  %v601_v18 = vld [vmem:[%s5112_s1 + $0xb10] sm:$0xff] }
  0x8e   : > { %1833 = vmatpush1.bf16.msra.mxu0 %v849_v30  ;;  %1616 = vmatprep.subr.bf16.mxu1 %v756_v32  ;;  %v588_v30 = vld [vmem:[%s5112_s1 + $0xaa8] sm:$0xff]  ;;  %v395_v32 = vld [vmem:[%s5112_s1 + $0x4a0] sm:$0xff] }
  0x8f   : > { %1895 = vmatprep.subr.bf16.mxu0 %v852_v37  ;;  %v3041_v37 = vld [vmem:[%s3578_s12 + $0x100] ss:$56 sps:$4 sm:$0xff]   ;;  %v765_v48 = vpack.c.bf16 %v397_v33, %v395_v32  ;;  %v867_v32 = vpack.c.bf16 %v601_v18, %v599_v17  ;;  %v429_v18 = vld [vmem:[%s5112_s1 + $0x5b0] sm:$0xff] }
  0x90   : > { %1556 = vmatmul.mubr.bf16.vlgmr.msra.gmra.mrb[0].mxu1 %v3024_v31  ;;  %v590_v31 = vld [vmem:[%s5112_s1 + $0xab8] sm:$0xff] }
  0x91   : > { %1617 = vmatpush1.bf16.msra.mxu1 %v755_v44  ;;  %1835 = vmatmul.mubr.bf16.vlgmr.msra.gmra.mrb[0].mxu0 %v3027_v36  ;;  %v587_v36 = vld [vmem:[%s5112_s1 + $0xaa0] sm:$0xff]  ;;  %v862_v41 = vpack.c.bf16 %v590_v31, %v588_v30  ;;  %v3042_v44 = vld [vmem:[%s3578_s12 + $0x15c] ss:$56 sps:$4 sm:$0xff]   ;;  %v416_v30 = vld [vmem:[%s5112_s1 + $0x548] sm:$0xff] }
  0x92   : > { %1896 = vmatpush1.bf16.msra.mxu0 %v851_v46  ;;  %1618 = vmatprep.subr.bf16.mxu1 %v758_v47  ;;  %v594_v46 = vld [vmem:[%s5112_s1 + $0xad8] sm:$0xff]  ;;  %v3044_v47 = vld [vmem:[%s3578_s12 + $0x174] ss:$56 sps:$4 sm:$0xff]   ;;  %v861_v51 = vpack.c.bf16 %v589_v40, %v587_v36 }
  0x93   : > { %1897 = vmatprep.subr.bf16.mxu0 %v854_v49  ;;  %1565 = vmatprep.mubr.bf16.mxu1 %v3030_v52  ;;  %v399_v49 = vld [vmem:[%s5112_s1 + $0x4c0] sm:$0xff]  ;;  %v768_v52 = vpack.c.bf16 %v402_v43, %v400_v42  ;;  %v608_v36 = vld [vmem:[%s5112_s1 + $0xb48] sm:$0xff]  ;;  %v417_v40 = vld [vmem:[%s5112_s1 + $0x550] sm:$0xff] }
  0x94   : > { %1844 = vmatprep.mubr.bf16.mxu0 %v3032_v55  ;;  %v404_v55 = vld [vmem:[%s5112_s1 + $0x4e8] sm:$0xff]  ;;  %v767_v63 = vpack.c.bf16 %v401_v50, %v399_v49  ;;  %v3053_v31 = vld [vmem:[%s3578_s12 + $0x1e0] ss:$56 sps:$4 sm:$0xff]  }
  0x95   : > { %1619 = vmatpush1.bf16.msra.mxu1 %v757_v56  ;;  %v864_v56 = vpack.c.bf16 %v594_v46, %v592_v45  ;;  %v770_v3 = vpack.c.bf16 %v406_v57, %v404_v55  ;;  %v607_v43 = vld [vmem:[%s5112_s1 + $0xb40] sm:$0xff]  ;;  %v420_v45 = vld [vmem:[%s5112_s1 + $0x568] sm:$0xff]  ;;  %v422_v46 = vld [vmem:[%s5112_s1 + $0x578] sm:$0xff] }
  0x96   : > { %1898 = vmatpush1.bf16.msra.mxu0 %v853_v59  ;;  %1620 = vmatprep.subr.bf16.mxu1 %v760_v60  ;;  %v598_v59 = vld [vmem:[%s5112_s1 + $0xaf8] sm:$0xff]  ;;  %v403_v60 = vld [vmem:[%s5112_s1 + $0x4e0] sm:$0xff]  ;;  %v612_v49 = vld [vmem:[%s5112_s1 + $0xb68] sm:$0xff] }
  0x97   : > { %1899 = vmatprep.subr.bf16.mxu0 %v856_v0  ;;  %v595_v0 = vld [vmem:[%s5112_s1 + $0xae0] sm:$0xff]  ;;  %v866_v5 = vpack.c.bf16 %v598_v59, %v596_v58  ;;  %v769_v12 = vpack.c.bf16 %v405_v61, %v403_v60  ;;  %v613_v57 = vld [vmem:[%s5112_s1 + $0xb70] sm:$0xff]  ;;  %v778_v60 = vpack.c.bf16 %v422_v46, %v420_v45  ;;  %v424_v61 = vld [vmem:[%s5112_s1 + $0x588] sm:$0xff] }
  0x98   : > { %1566 = vmatmul.mubr.bf16.gmra.mrb[4].mxu1 %v3034_v6  ;;  %v408_v6 = vld [vmem:[%s5112_s1 + $0x508] sm:$0xff]  ;;  %v865_v15 = vpack.c.bf16 %v597_v4, %v595_v0  ;;  %v627_v45 = vld [vmem:[%s5112_s1 + $0xbe0] sm:$0xff]  ;;  %v629_v46 = vld [vmem:[%s5112_s1 + $0xbf0] sm:$0xff] }
  0x99   : > { %1621 = vmatpush1.bf16.msra.mxu1 %v759_v7  ;;  %1845 = vmatmul.mubr.bf16.gmra.mrb[4].mxu0 %v3035_v9  ;;  %v410_v7 = vld [vmem:[%s5112_s1 + $0x518] sm:$0xff]  ;;  %v600_v9 = vld [vmem:[%s5112_s1 + $0xb08] sm:$0xff] }
  0x9a   : > { %1900 = vmatpush1.bf16.msra.mxu0 %v855_v10  ;;  %1622 = vmatprep.subr.bf16.mxu1 %v762_v11  ;;  %v602_v10 = vld [vmem:[%s5112_s1 + $0xb18] sm:$0xff]  ;;  %v3059_v58 = vld [vmem:[%s3578_s12 + $0x250] ss:$56 sps:$4 sm:$0xff]  }
  0x9b   : > { %1901 = vmatprep.subr.bf16.mxu0 %v858_v13  ;;  %1575 = vmatprep.mubr.bf16.mxu1 %v3036_v16  ;;  %v3050_v11 = vld [vmem:[%s3578_s12 + $0x1e4] ss:$56 sps:$4 sm:$0xff]   ;;  %v772_v16 = vpack.c.bf16 %v410_v7, %v408_v6 }
  0x9c   : > { %1854 = vmatprep.mubr.bf16.mxu0 %v3038_v19  ;;  %v407_v13 = vld [vmem:[%s5112_s1 + $0x500] sm:$0xff]  ;;  %v412_v19 = vld [vmem:[%s5112_s1 + $0x528] sm:$0xff] }
  0x9d   : > { %1623 = vmatpush1.bf16.msra.mxu1 %v761_v20  ;;  %v868_v20 = vpack.c.bf16 %v602_v10, %v600_v9  ;;  %v771_v27 = vpack.c.bf16 %v409_v14, %v407_v13  ;;  %v774_v33 = vpack.c.bf16 %v414_v21, %v412_v19  ;;  %v423_v7 = vld [vmem:[%s5112_s1 + $0x580] sm:$0xff]  ;;  %v430_v13 = vld [vmem:[%s5112_s1 + $0x5b8] sm:$0xff]  ;;  %v620_v14 = vld [vmem:[%s5112_s1 + $0xba8] sm:$0xff] }
  0x9e   : > { %1902 = vmatpush1.bf16.msra.mxu0 %v857_v23  ;;  %1624 = vmatprep.subr.bf16.mxu1 %v764_v24  ;;  %v606_v23 = vld [vmem:[%s5112_s1 + $0xb38] sm:$0xff]  ;;  %v411_v24 = vld [vmem:[%s5112_s1 + $0x520] sm:$0xff] }
  0x9f   : > { %1903 = vmatprep.subr.bf16.mxu0 %v860_v28  ;;  %v603_v28 = vld [vmem:[%s5112_s1 + $0xb20] sm:$0xff]  ;;  %v773_v42 = vpack.c.bf16 %v413_v25, %v411_v24  ;;  %v432_v24 = vld [vmem:[%s5112_s1 + $0x5c8] sm:$0xff]  ;;  %v434_v25 = vld [vmem:[%s5112_s1 + $0x5d8] sm:$0xff] }
  0xa0   : > { %1576 = vmatmul.mubr.bf16.gmra.mrb[8].mxu1 %v3040_v34  ;;  %v418_v34 = vld [vmem:[%s5112_s1 + $0x558] sm:$0xff]  ;;  %v615_v9 = vld [vmem:[%s5112_s1 + $0xb80] sm:$0xff] }
  0xa1   : > { %1625 = vmatpush1.bf16.msra.mxu1 %v763_v35  ;;  %1855 = vmatmul.mubr.bf16.gmra.mrb[8].mxu0 %v3041_v37  ;;  %v870_v35 = vpack.c.bf16 %v606_v23, %v604_v22  ;;  %v610_v37 = vld [vmem:[%s5112_s1 + $0xb58] sm:$0xff]  ;;  %v619_v21 = vld [vmem:[%s5112_s1 + $0xba0] sm:$0xff]  ;;  %v621_v23 = vld [vmem:[%s5112_s1 + $0xbb0] sm:$0xff] }
  0xa2   : > { %1904 = vmatpush1.bf16.msra.mxu0 %v859_v38  ;;  %1626 = vmatprep.subr.bf16.mxu1 %v766_v39  ;;  %v3054_v38 = vld [vmem:[%s3578_s12 + $0x23c] ss:$56 sps:$4 sm:$0xff]   ;;  %v415_v39 = vld [vmem:[%s5112_s1 + $0x540] sm:$0xff]  ;;  %v872_v50 = vpack.c.bf16 %v610_v37, %v608_v36 }
  0xa3   : > { %1905 = vmatprep.subr.bf16.mxu0 %v862_v41  ;;  %1585 = vmatprep.mubr.bf16.mxu1 %v3042_v44  ;;  %v3056_v41 = vld [vmem:[%s3578_s12 + $0x254] ss:$56 sps:$4 sm:$0xff]   ;;  %v775_v55 = vpack.c.bf16 %v417_v40, %v415_v39  ;;  %v438_v37 = vld [vmem:[%s5112_s1 + $0x5f8] sm:$0xff] }
  0xa4   : > { %1864 = vmatprep.mubr.bf16.mxu0 %v3044_v47  ;;  %v609_v44 = vld [vmem:[%s5112_s1 + $0xb50] sm:$0xff]  ;;  %v869_v47 = vpack.c.bf16 %v605_v29, %v603_v28  ;;  %v431_v28 = vld [vmem:[%s5112_s1 + $0x5c0] sm:$0xff]  ;;  %v630_v39 = vld [vmem:[%s5112_s1 + $0xbf8] sm:$0xff] }
  0xa5   : > { %1627 = vmatpush1.bf16.msra.mxu1 %v765_v48  ;;  %v776_v48 = vpack.c.bf16 %v418_v34, %v416_v30  ;;  %v871_v59 = vpack.c.bf16 %v609_v44, %v607_v43  ;;  %v433_v30 = vld [vmem:[%s5112_s1 + $0x5d0] sm:$0xff]  ;;  %v784_v34 = vpack.c.bf16 %v434_v25, %v432_v24  ;;  %v654_v24 = vld [vmem:[%s5112_s1 + $0xcb8] sm:$0xff] }
  0xa6   : > { %1906 = vmatpush1.bf16.msra.mxu0 %v861_v51  ;;  %1628 = vmatprep.subr.bf16.mxu1 %v768_v52  ;;  %v614_v51 = vld [vmem:[%s5112_s1 + $0xb78] sm:$0xff]  ;;  %v419_v52 = vld [vmem:[%s5112_s1 + $0x560] sm:$0xff]  ;;  %v783_v40 = vpack.c.bf16 %v433_v30, %v431_v28  ;;  %v437_v44 = vld [vmem:[%s5112_s1 + $0x5f0] sm:$0xff] }
  0xa7   : > { %1907 = vmatprep.subr.bf16.mxu0 %v864_v56  ;;  %v611_v56 = vld [vmem:[%s5112_s1 + $0xb60] sm:$0xff]  ;;  %v874_v0 = vpack.c.bf16 %v614_v51, %v612_v49  ;;  %v777_v4 = vpack.c.bf16 %v421_v53, %v419_v52  ;;  %v634_v49 = vld [vmem:[%s5112_s1 + $0xc18] sm:$0xff]  ;;  %v881_v51 = vpack.c.bf16 %v629_v46, %v627_v45  ;;  %v3076_v25 = vld [vmem:[%s3578_s12 + $0xf0] ss:$56 sps:$4 sm:$0xff]  }
  0xa8   : > { %1586 = vmatmul.mubr.bf16.gmra.mrb[12].mxu1 %v3046_v62  ;;  %v426_v62 = vld [vmem:[%s5112_s1 + $0x598] sm:$0xff]  ;;  %v631_v53 = vld [vmem:[%s5112_s1 + $0xc00] sm:$0xff]  ;;  %v653_v30 = vld [vmem:[%s5112_s1 + $0xcb0] sm:$0xff] }
  0xa9   : > { %1629 = vmatpush1.bf16.msra.mxu1 %v767_v63  ;;  %1865 = vmatmul.mubr.bf16.gmra.mrb[12].mxu0 %v3047_v1  ;;  %v616_v63 = vld [vmem:[%s5112_s1 + $0xb88] sm:$0xff]  ;;  %v618_v1 = vld [vmem:[%s5112_s1 + $0xb98] sm:$0xff]  ;;  %v780_v6 = vpack.c.bf16 %v426_v62, %v424_v61  ;;  %v635_v61 = vld [vmem:[%s5112_s1 + $0xc20] sm:$0xff] }
  0xaa   : > { %1908 = vmatpush1.bf16.msra.mxu0 %v863_v2  ;;  %1630 = vmatprep.subr.bf16.mxu1 %v770_v3  ;;  %v3062_v2 = vld [vmem:[%s3578_s12 + $0x14] ss:$56 sps:$4 sm:$0xff]   ;;  %v876_v10 = vpack.c.bf16 %v618_v1, %v616_v63  ;;  %v3066_v63 = vld [vmem:[%s3578_s12 + $0x84] ss:$56 sps:$4 sm:$0xff]  }
  0xab   : > { %1909 = vmatprep.subr.bf16.mxu0 %v866_v5  ;;  %1595 = vmatprep.mubr.bf16.mxu1 %v3048_v8  ;;  %v3065_v3 = vld [vmem:[%s3578_s12 + $0x2c] ss:$56 sps:$4 sm:$0xff]   ;;  %v873_v5 = vpack.c.bf16 %v613_v57, %v611_v56  ;;  %v425_v8 = vld [vmem:[%s5112_s1 + $0x590] sm:$0xff]  ;;  %v638_v56 = vld [vmem:[%s5112_s1 + $0xc38] sm:$0xff] }
  0xac   : > { %1874 = vmatprep.mubr.bf16.mxu0 %v3050_v11  ;;  %v617_v11 = vld [vmem:[%s5112_s1 + $0xb90] sm:$0xff]  ;;  %v779_v17 = vpack.c.bf16 %v425_v8, %v423_v7  ;;  %v642_v1 = vld [vmem:[%s5112_s1 + $0xc58] sm:$0xff]  ;;  %v659_v45 = vld [vmem:[%s5112_s1 + $0xce0] sm:$0xff] }
  0xad   : > { %1631 = vmatpush1.bf16.msra.mxu1 %v769_v12  ;;  %v428_v12 = vld [vmem:[%s5112_s1 + $0x5a8] sm:$0xff]  ;;  %v875_v19 = vpack.c.bf16 %v617_v11, %v615_v9  ;;  %v637_v62 = vld [vmem:[%s5112_s1 + $0xc30] sm:$0xff]  ;;  %v643_v11 = vld [vmem:[%s5112_s1 + $0xc60] sm:$0xff] }
  0xae   : > { %1910 = vmatpush1.bf16.msra.mxu0 %v865_v15  ;;  %1632 = vmatprep.subr.bf16.mxu1 %v772_v16  ;;  %v622_v15 = vld [vmem:[%s5112_s1 + $0xbb8] sm:$0xff]  ;;  %v427_v16 = vld [vmem:[%s5112_s1 + $0x5a0] sm:$0xff]  ;;  %v3060_v57 = vld [vmem:[%s3578_s12 + $0x10] ss:$56 sps:$4 sm:$0xff]  }
  0xaf   : > { %1911 = vmatprep.subr.bf16.mxu0 %v868_v20  ;;  %v782_v20 = vpack.c.bf16 %v430_v13, %v428_v12  ;;  %v878_v22 = vpack.c.bf16 %v622_v15, %v620_v14  ;;  %v781_v29 = vpack.c.bf16 %v429_v18, %v427_v16  ;;  %v641_v7 = vld [vmem:[%s5112_s1 + $0xc50] sm:$0xff]  ;;  %v644_v9 = vld [vmem:[%s5112_s1 + $0xc68] sm:$0xff] }
  0xb0   : > { %1596 = vmatmul.mubr.bf16.gmra.mrb[16].mxu1 %v3052_v26  ;;  %v624_v26 = vld [vmem:[%s5112_s1 + $0xbc8] sm:$0xff]  ;;  %v3071_v8 = vld [vmem:[%s3578_s12 + $0x98] ss:$56 sps:$4 sm:$0xff]  }
  0xb1   : > { %1633 = vmatpush1.bf16.msra.mxu1 %v771_v27  ;;  %1875 = vmatmul.mubr.bf16.gmra.mrb[16].mxu0 %v3053_v31  ;;  %v626_v27 = vld [vmem:[%s5112_s1 + $0xbd8] sm:$0xff]  ;;  %v623_v31 = vld [vmem:[%s5112_s1 + $0xbc0] sm:$0xff]  ;;  %v645_v13 = vld [vmem:[%s5112_s1 + $0xc70] sm:$0xff] }
  0xb2   : > { %1912 = vmatpush1.bf16.msra.mxu0 %v867_v32  ;;  %1634 = vmatprep.subr.bf16.mxu1 %v774_v33  ;;  %v625_v32 = vld [vmem:[%s5112_s1 + $0xbd0] sm:$0xff]  ;;  %v877_v33 = vpack.c.bf16 %v621_v23, %v619_v21  ;;  %v880_v36 = vpack.c.bf16 %v626_v27, %v624_v26  ;;  %v648_v16 = vld [vmem:[%s5112_s1 + $0xc88] sm:$0xff]  ;;  %v647_v21 = vld [vmem:[%s5112_s1 + $0xc80] sm:$0xff] }
  0xb3   : > { %1913 = vmatprep.subr.bf16.mxu0 %v870_v35  ;;  %1605 = vmatprep.mubr.bf16.mxu1 %v3054_v38  ;;  %v436_v35 = vld [vmem:[%s5112_s1 + $0x5e8] sm:$0xff]  ;;  %v661_v46 = vld [vmem:[%s5112_s1 + $0xcf0] sm:$0xff] }
  0xb4   : > { %1884 = vmatprep.mubr.bf16.mxu0 %v3056_v41  ;;  %v628_v38 = vld [vmem:[%s5112_s1 + $0xbe8] sm:$0xff]  ;;  %v435_v41 = vld [vmem:[%s5112_s1 + $0x5e0] sm:$0xff]  ;;  %v786_v43 = vpack.c.bf16 %v438_v37, %v436_v35 }
  0xb5   : > { %1635 = vmatpush1.bf16.msra.mxu1 %v773_v42  ;;  %v879_v42 = vpack.c.bf16 %v625_v32, %v623_v31  ;;  %v3072_v14 = vld [vmem:[%s3578_s12 + $0xf4] ss:$56 sps:$4 sm:$0xff]   ;;  %v3077_v26 = vld [vmem:[%s3578_s12 + $0x108] ss:$56 sps:$4 sm:$0xff]   ;;  %v3078_v31 = vld [vmem:[%s3578_s12 + $0x164] ss:$56 sps:$4 sm:$0xff]  }
  0xb6   : > { %1914 = vmatpush1.bf16.msra.mxu0 %v869_v47  ;;  %1636 = vmatprep.subr.bf16.mxu1 %v776_v48  ;;  %v882_v47 = vpack.c.bf16 %v630_v39, %v628_v38  ;;  %v632_v48 = vld [vmem:[%s5112_s1 + $0xc08] sm:$0xff]  ;;  %v655_v37 = vld [vmem:[%s5112_s1 + $0xcc0] sm:$0xff]  ;;  %v657_v38 = vld [vmem:[%s5112_s1 + $0xcd0] sm:$0xff] }
  0xb7   : > { %1915 = vmatprep.subr.bf16.mxu0 %v872_v50  ;;  %v785_v50 = vpack.c.bf16 %v437_v44, %v435_v41  ;;  %v884_v52 = vpack.c.bf16 %v634_v49, %v632_v48  ;;  %v3074_v18 = vld [vmem:[%s3578_s12 + $0x10c] ss:$56 sps:$4 sm:$0xff]   ;;  %v3082_v41 = vld [vmem:[%s3578_s12 + $0x160] ss:$56 sps:$4 sm:$0xff]  }
  0xb8   : > { %1606 = vmatmul.mubr.bf16.gmra.mrb[20].mxu1 %v3058_v54  ;;  %v633_v54 = vld [vmem:[%s5112_s1 + $0xc10] sm:$0xff]  ;;  %v652_v23 = vld [vmem:[%s5112_s1 + $0xca8] sm:$0xff]  ;;  %v666_v49 = vld [vmem:[%s5112_s1 + $0xd18] sm:$0xff] }
  0xb9   : > { %1637 = vmatpush1.bf16.msra.mxu1 %v775_v55  ;;  %1885 = vmatmul.mubr.bf16.gmra.mrb[20].mxu0 %v3059_v58  ;;  %v636_v55 = vld [vmem:[%s5112_s1 + $0xc28] sm:$0xff]  ;;  %v894_v28 = vpack.c.bf16 %v654_v24, %v652_v23  ;;  %v686_v24 = vld [vmem:[%s5112_s1 + $0xdb8] sm:$0xff] }
  0xba   : > { %1916 = vmatpush1.bf16.msra.mxu0 %v871_v59  ;;  %1638 = vmatprep.subr.bf16.mxu1 %v778_v60  ;;  %v3063_v58 = vld [vmem:[%s3578_s12 + $0x28] ss:$56 sps:$4 sm:$0xff]   ;;  %v883_v59 = vpack.c.bf16 %v633_v54, %v631_v53  ;;  %v886_v60 = vpack.c.bf16 %v638_v56, %v636_v55  ;;  %v665_v54 = vld [vmem:[%s5112_s1 + $0xd10] sm:$0xff]  ;;  %v670_v56 = vld [vmem:[%s5112_s1 + $0xd38] sm:$0xff] }
  0xbb   : > { %1917 = vmatprep.subr.bf16.mxu0 %v874_v0  ;;  %1648 = vmatprep.mubr.bf16.mxu1 %v3062_v2  ;;  %v640_v0 = vld [vmem:[%s5112_s1 + $0xc48] sm:$0xff]  ;;  %v3068_v2 = vld [vmem:[%s3578_s12 + $0x9c] ss:$56 sps:$4 sm:$0xff]   ;;  %v663_v53 = vld [vmem:[%s5112_s1 + $0xd00] sm:$0xff] }
  0xbc   : > { %1927 = vmatprep.mubr.bf16.mxu0 %v3065_v3  ;;  %v885_v3 = vpack.c.bf16 %v637_v62, %v635_v61  ;;  %v656_v32 = vld [vmem:[%s5112_s1 + $0xcc8] sm:$0xff]  ;;  %v667_v61 = vld [vmem:[%s5112_s1 + $0xd20] sm:$0xff]  ;;  %v669_v62 = vld [vmem:[%s5112_s1 + $0xd30] sm:$0xff] }
  0xbd   : > { %1639 = vmatpush1.bf16.msra.mxu1 %v777_v4  ;;  %v639_v4 = vld [vmem:[%s5112_s1 + $0xc40] sm:$0xff]  ;;  %v660_v39 = vld [vmem:[%s5112_s1 + $0xce8] sm:$0xff] }
  0xbe   : > { %1918 = vmatpush1.bf16.msra.mxu0 %v873_v5  ;;  %1640 = vmatprep.subr.bf16.mxu1 %v780_v6  ;;  %v3070_v5 = vld [vmem:[%s3578_s12 + $0x80] ss:$56 sps:$4 sm:$0xff]   ;;  %v888_v6 = vpack.c.bf16 %v642_v1, %v640_v0  ;;  %v887_v12 = vpack.c.bf16 %v641_v7, %v639_v4  ;;  %v664_v48 = vld [vmem:[%s5112_s1 + $0xd08] sm:$0xff] }
  0xbf   : > { %1919 = vmatprep.subr.bf16.mxu0 %v876_v10  ;;  %v646_v10 = vld [vmem:[%s5112_s1 + $0xc78] sm:$0xff]  ;;  %v668_v55 = vld [vmem:[%s5112_s1 + $0xd28] sm:$0xff] }
  0xc0   : > { %v890_v15 = vpack.c.bf16 %v646_v10, %v644_v9  ;;  %v672_v0 = vld [vmem:[%s5112_s1 + $0xd48] sm:$0xff]  ;;  %v674_v1 = vld [vmem:[%s5112_s1 + $0xd58] sm:$0xff] }
  0xc1   : > { %1641 = vmatpush1.bf16.msra.mxu1 %v779_v17  ;;  %v650_v17 = vld [vmem:[%s5112_s1 + $0xc98] sm:$0xff]  ;;  %v904_v4 = vpack.c.bf16 %v674_v1, %v672_v0  ;;  %v676_v7 = vld [vmem:[%s5112_s1 + $0xd68] sm:$0xff] }
  0xc2   : > { %1920 = vmatpush1.bf16.msra.mxu0 %v875_v19  ;;  %1642 = vmatprep.subr.bf16.mxu1 %v782_v20  ;;  %v889_v19 = vpack.c.bf16 %v645_v13, %v643_v11  ;;  %v892_v20 = vpack.c.bf16 %v650_v17, %v648_v16  ;;  %v3094_v9 = vld [vmem:[%s3578_s12 + $0x240] ss:$56 sps:$4 sm:$0xff]   ;;  %v3098_v17 = vld [vmem:[%s3578_s12 + $0x34] ss:$56 sps:$4 sm:$0xff]  }
  0xc3   : > { %1921 = vmatprep.subr.bf16.mxu0 %v878_v22  ;;  %v649_v22 = vld [vmem:[%s5112_s1 + $0xc90] sm:$0xff]  ;;  %v675_v13 = vld [vmem:[%s5112_s1 + $0xd60] sm:$0xff]  ;;  %v682_v16 = vld [vmem:[%s5112_s1 + $0xd98] sm:$0xff] }
  0xc4   : > { %v891_v27 = vpack.c.bf16 %v649_v22, %v647_v21  ;;  %v3095_v10 = vld [vmem:[%s3578_s12 + $0x258] ss:$56 sps:$4 sm:$0xff]   ;;  %v679_v21 = vld [vmem:[%s5112_s1 + $0xd80] sm:$0xff]  ;;  %v684_v23 = vld [vmem:[%s5112_s1 + $0xda8] sm:$0xff] }
  0xc5   : > { %1643 = vmatpush1.bf16.msra.mxu1 %v781_v29  ;;  %v651_v29 = vld [vmem:[%s5112_s1 + $0xca0] sm:$0xff]  ;;  %v681_v22 = vld [vmem:[%s5112_s1 + $0xd90] sm:$0xff] }
  0xc6   : > { %1922 = vmatpush1.bf16.msra.mxu0 %v877_v33  ;;  %1644 = vmatprep.subr.bf16.mxu1 %v784_v34  ;;  %v658_v33 = vld [vmem:[%s5112_s1 + $0xcd8] sm:$0xff]  ;;  %v893_v35 = vpack.c.bf16 %v653_v30, %v651_v29  ;;  %v688_v29 = vld [vmem:[%s5112_s1 + $0xdc8] sm:$0xff] }
  0xc7   : > { %1923 = vmatprep.subr.bf16.mxu0 %v880_v36  ;;  %v3080_v34 = vld [vmem:[%s3578_s12 + $0x17c] ss:$56 sps:$4 sm:$0xff]   ;;  %v896_v36 = vpack.c.bf16 %v658_v33, %v656_v32  ;;  %v687_v33 = vld [vmem:[%s5112_s1 + $0xdc0] sm:$0xff] }
  0xc8   : > { %v690_v30 = vld [vmem:[%s5112_s1 + $0xdd8] sm:$0xff] }
  0xc9   : > { %1645 = vmatpush1.bf16.msra.mxu1 %v783_v40  ;;  %v662_v40 = vld [vmem:[%s5112_s1 + $0xcf8] sm:$0xff]  ;;  %v912_v32 = vpack.c.bf16 %v690_v30, %v688_v29 }
  0xca   : > { %1924 = vmatpush1.bf16.msra.mxu0 %v879_v42  ;;  %1646 = vmatprep.subr.bf16.mxu1 %v786_v43  ;;  %v3083_v42 = vld [vmem:[%s3578_s12 + $0x178] ss:$56 sps:$4 sm:$0xff]   ;;  %v895_v43 = vpack.c.bf16 %v657_v38, %v655_v37  ;;  %v898_v44 = vpack.c.bf16 %v662_v40, %v660_v39  ;;  %v3104_v38 = vld [vmem:[%s3578_s12 + $0x1f4] ss:$56 sps:$4 sm:$0xff]   ;;  %v3102_v39 = vld [vmem:[%s3578_s12 + $0xa4] ss:$56 sps:$4 sm:$0xff]  }
  0xcb   : > { %1925 = vmatprep.subr.bf16.mxu0 %v882_v47  ;;  %v3084_v47 = vld [vmem:[%s3578_s12 + $0x1d4] ss:$56 sps:$4 sm:$0xff]   ;;  %v3096_v37 = vld [vmem:[%s3578_s12 + $0x30] ss:$56 sps:$4 sm:$0xff]  }
  0xcc   : > { %v3107_v40 = vld [vmem:[%s3578_s12 + $0x1f0] ss:$56 sps:$4 sm:$0xff]  }
  0xcd   : > { %1647 = vmatpush1.bf16.msra.mxu1 %v785_v50  ;;  %v3086_v50 = vld [vmem:[%s3578_s12 + $0x1ec] ss:$56 sps:$4 sm:$0xff]  }
  0xce   : > { %1926 = vmatpush1.bf16.msra.mxu0 %v881_v51  ;;  %2768 = vmatprep.subr.bf16.mxu1 %v884_v52  ;;  %v897_v51 = vpack.c.bf16 %v661_v46, %v659_v45  ;;  %v3112_v45 = vld [vmem:[%s3578_s12 + $0x110] ss:$56 sps:$4 sm:$0xff]  }
  0xcf   : > { %1988 = vmatprep.subr.bf16.mxu0 %v884_v52  ;;  %v900_v52 = vpack.c.bf16 %v666_v49, %v664_v48 }
  0xd0   : > { %1649 = vmatmul.mubr.bf16.vlgmr.msra.gmra.mrb[0].mxu1 %v3060_v57  ;;  %v3088_v57 = vld [vmem:[%s3578_s12 + $0x1d0] ss:$56 sps:$4 sm:$0xff]  }
  0xd1   : > { %1928 = vmatmul.mubr.bf16.vlgmr.msra.gmra.mrb[0].mxu0 %v3063_v58  ;;  %2783 = vmatpush1.bf16.msra.mxu1 %v883_v59  ;;  %v3089_v58 = vld [vmem:[%s3578_s12 + $0x1e8] ss:$56 sps:$4 sm:$0xff]  }
  0xd2   : > { %1989 = vmatpush1.bf16.msra.mxu0 %v883_v59  ;;  %2769 = vmatprep.subr.bf16.mxu1 %v886_v60  ;;  %v899_v59 = vpack.c.bf16 %v665_v54, %v663_v53 }
  0xd3   : > { %1990 = vmatprep.subr.bf16.mxu0 %v886_v60  ;;  %1658 = vmatprep.mubr.bf16.mxu1 %v3066_v63  ;;  %v902_v60 = vpack.c.bf16 %v670_v56, %v668_v55  ;;  %v3090_v63 = vld [vmem:[%s3578_s12 + $0x244] ss:$56 sps:$4 sm:$0xff]  }
  0xd4   : > { %1937 = vmatprep.mubr.bf16.mxu0 %v3068_v2  ;;  %v3092_v2 = vld [vmem:[%s3578_s12 + $0x25c] ss:$56 sps:$4 sm:$0xff]  }
  0xd5   : > { %2784 = vmatpush1.bf16.msra.mxu1 %v885_v3 }
  0xd6   : > { %1991 = vmatpush1.bf16.msra.mxu0 %v885_v3  ;;  %2770 = vmatprep.subr.bf16.mxu1 %v888_v6  ;;  %v901_v3 = vpack.c.bf16 %v669_v62, %v667_v61 }
  0xd7   : > { %1992 = vmatprep.subr.bf16.mxu0 %v888_v6  ;;  %v673_v6 = vld [vmem:[%s5112_s1 + $0xd50] sm:$0xff] }
  0xd8   : > { %1659 = vmatmul.mubr.bf16.gmra.mrb[4].mxu1 %v3070_v5  ;;  %v671_v5 = vld [vmem:[%s5112_s1 + $0xd40] sm:$0xff] }
  0xd9   : > { %1938 = vmatmul.mubr.bf16.gmra.mrb[4].mxu0 %v3071_v8  ;;  %2785 = vmatpush1.bf16.msra.mxu1 %v887_v12  ;;  %v678_v8 = vld [vmem:[%s5112_s1 + $0xd78] sm:$0xff]  ;;  %v903_v11 = vpack.c.bf16 %v673_v6, %v671_v5 }
  0xda   : > { %1993 = vmatpush1.bf16.msra.mxu0 %v887_v12  ;;  %2771 = vmatprep.subr.bf16.mxu1 %v890_v15  ;;  %v906_v12 = vpack.c.bf16 %v678_v8, %v676_v7 }
  0xdb   : > { %1994 = vmatprep.subr.bf16.mxu0 %v890_v15  ;;  %1668 = vmatprep.mubr.bf16.mxu1 %v3072_v14  ;;  %v677_v14 = vld [vmem:[%s5112_s1 + $0xd70] sm:$0xff]  ;;  %v680_v15 = vld [vmem:[%s5112_s1 + $0xd88] sm:$0xff] }
  0xdc   : > { %1947 = vmatprep.mubr.bf16.mxu0 %v3074_v18  ;;  %v3101_v18 = vld [vmem:[%s3578_s12 + $0x184] ss:$56 sps:$4 sm:$0xff]  }
  0xdd   : > { %2786 = vmatpush1.bf16.msra.mxu1 %v889_v19 }
  0xde   : > { %1995 = vmatpush1.bf16.msra.mxu0 %v889_v19  ;;  %2772 = vmatprep.subr.bf16.mxu1 %v892_v20  ;;  %v905_v19 = vpack.c.bf16 %v677_v14, %v675_v13 }
  0xdf   : > { %1996 = vmatprep.subr.bf16.mxu0 %v892_v20  ;;  %v908_v20 = vpack.c.bf16 %v682_v16, %v680_v15 }
  0xe0   : > { %1669 = vmatmul.mubr.bf16.gmra.mrb[8].mxu1 %v3076_v25  ;;  %v907_v25 = vpack.c.bf16 %v681_v22, %v679_v21 }
  0xe1   : > { %1948 = vmatmul.mubr.bf16.gmra.mrb[8].mxu0 %v3077_v26  ;;  %2787 = vmatpush1.bf16.msra.mxu1 %v891_v27  ;;  %v910_v26 = vpack.c.bf16 %v686_v24, %v684_v23 }
  0xe2   : > { %1997 = vmatpush1.bf16.msra.mxu0 %v891_v27  ;;  %2773 = vmatprep.subr.bf16.mxu1 %v894_v28  ;;  %v683_v27 = vld [vmem:[%s5112_s1 + $0xda0] sm:$0xff] }
  0xe3   : > { %1998 = vmatprep.subr.bf16.mxu0 %v894_v28  ;;  %1678 = vmatprep.mubr.bf16.mxu1 %v3078_v31  ;;  %v685_v28 = vld [vmem:[%s5112_s1 + $0xdb0] sm:$0xff] }
  0xe4   : > { %1957 = vmatprep.mubr.bf16.mxu0 %v3080_v34  ;;  %v909_v31 = vpack.c.bf16 %v685_v28, %v683_v27  ;;  %v689_v34 = vld [vmem:[%s5112_s1 + $0xdd0] sm:$0xff] }
  0xe5   : > { %2788 = vmatpush1.bf16.msra.mxu1 %v893_v35 }
  0xe6   : > { %1999 = vmatpush1.bf16.msra.mxu0 %v893_v35  ;;  %2774 = vmatprep.subr.bf16.mxu1 %v896_v36  ;;  %v911_v35 = vpack.c.bf16 %v689_v34, %v687_v33 }
  0xe7   : > { %2000 = vmatprep.subr.bf16.mxu0 %v896_v36  ;;  %v3099_v36 = vld [vmem:[%s3578_s12 + $0x180] ss:$56 sps:$4 sm:$0xff]  }
  0xe8   : > { %1679 = vmatmul.mubr.bf16.gmra.mrb[12].mxu1 %v3082_v41  ;;  %v3106_v41 = vld [vmem:[%s3578_s12 + $0xa0] ss:$56 sps:$4 sm:$0xff]  }
  0xe9   : > { %1958 = vmatmul.mubr.bf16.gmra.mrb[12].mxu0 %v3083_v42  ;;  %2789 = vmatpush1.bf16.msra.mxu1 %v895_v43  ;;  %v3110_v42 = vld [vmem:[%s3578_s12 + $0x264] ss:$56 sps:$4 sm:$0xff]  }
  0xea   : > { %2001 = vmatpush1.bf16.msra.mxu0 %v895_v43  ;;  %2775 = vmatprep.subr.bf16.mxu1 %v898_v44  ;;  %v3108_v43 = vld [vmem:[%s3578_s12 + $0x114] ss:$56 sps:$4 sm:$0xff]  }
  0xeb   : > { %2002 = vmatprep.subr.bf16.mxu0 %v898_v44  ;;  %1688 = vmatprep.mubr.bf16.mxu1 %v3084_v47  ;;  %v3113_v44 = vld [vmem:[%s3578_s12 + $0x260] ss:$56 sps:$4 sm:$0xff]   ;;  %s2669_s12 = sshll.u32 %s5124_s28, 3  ;;  %s223_s28 = sand.u32 1, %s3192_s16  }
  0xec   : > { %1967 = vmatprep.mubr.bf16.mxu0 %v3086_v50  ;;  %s4920_s10 = scalar_lea.vmem %s5113_s2, %s2669_s12  ;;  %s4942_s13 = scalar_lea.vmem %s5114_s3, %s2669_s12 }
  0xed   : > { %2790 = vmatpush1.bf16.msra.mxu1 %v897_v51  ;;  %s2942_s14 = smul.u32 192, %s223_s28  ;;  %s5070_s19 = scalar_lea.sflag [#allocation3], %s223_s28 }
  0xee   : > { %2003 = vmatpush1.bf16.msra.mxu0 %v897_v51  ;;  %2776 = vmatprep.subr.bf16.mxu1 %v900_v52  ;;  %s3142_s12 = sshll.u32 %s3203_s7, 4  ;;  %s3143_s12 = int_to_ptr.vmem [resolvable:$false] %s3142_s12 }
  0xef   : > { %2004 = vmatprep.subr.bf16.mxu0 %v900_v52  ;;  %s5003_s20 = scalar_lea.vmem [#allocation2], %s2942_s14  ;;  %s3144_s8 = scalar_lea.vmem %s3143_s12, 6144 }
  0xf0   : > { %1689 = vmatmul.mubr.bf16.gmra.mrb[16].mxu1 %v3088_v57  ;;  %s2578_s23 = sshll.u32 %s5003_s20, 4  ;;  %s5058_s23 = int_to_ptr.vmem [resolvable:$true] %s2578_s23 }
  0xf1   : > { %1968 = vmatmul.mubr.bf16.gmra.mrb[16].mxu0 %v3089_v58  ;;  %2791 = vmatpush1.bf16.msra.mxu1 %v899_v59  ;;  %s3138_s6 = scalar_lea.vmem %s5058_s23, 3072  ;;  %p3145_p0 = scmp.lt.s32.totalorder %s5058_s23, %s3143_s12 }
  0xf2   : > { %2005 = vmatpush1.bf16.msra.mxu0 %v899_v59  ;;  %2777 = vmatprep.subr.bf16.mxu1 %v902_v60  ;;  %p3139_p11 = scmp.ne.s32.totalorder %s5058_s23, %s3138_s6  ;;  %p3146_p1 = scmp.lt.s32.totalorder %s3144_s8, %s3138_s6 }
  0xf3   : > { %2006 = vmatprep.subr.bf16.mxu0 %v902_v60  ;;  %1698 = vmatprep.mubr.bf16.mxu1 %v3090_v63 }
  0xf4   : > { %1977 = vmatprep.mubr.bf16.mxu0 %v3092_v2  ;;  %p3140_p12 = pnand %p3139_p11, %p3269_p5  ;;  %p3147_p2 = por %p3146_p1, %p3145_p0 }
  0xf5   : > { %2792 = vmatpush1.bf16.msra.mxu1 %v901_v3 }
  0xf6   : > { %2007 = vmatpush1.bf16.msra.mxu0 %v901_v3  ;;  %2778 = vmatprep.subr.bf16.mxu1 %v904_v4  ;;  %p3141_p13 = pneg %p3140_p12 }
  0xf7   : > { %2008 = vmatprep.subr.bf16.mxu0 %v904_v4 }
  0xf8   : > { %1699 = vmatmul.mubr.bf16.gmra.mrb[20].mxu1 %v3094_v9  ;;  %p3148_p3 = pnand %p3147_p2, %p3141_p13 }
  0xf9   : > { %1978 = vmatmul.mubr.bf16.gmra.mrb[20].mxu0 %v3095_v10  ;;  %2793 = vmatpush1.bf16.msra.mxu1 %v903_v11 }
  0xfa   : > { %2009 = vmatpush1.bf16.msra.mxu0 %v903_v11  ;;  %2779 = vmatprep.subr.bf16.mxu1 %v906_v12 }
  0xfb   : > { %2010 = vmatprep.subr.bf16.mxu0 %v906_v12  ;;  %2755 = vmatprep.mubr.msk.bf16.mxu0 %vm1411_vm0, %v3098_v17 }
  0xfc   : > { %2758 = vmatprep.mubr.msk.bf16.mxu1 %vm1411_vm0, %v3101_v18 }
  0xfd   : > { %2794 = vmatpush1.bf16.msra.mxu1 %v905_v19 }
  0xfe   : > { %2011 = vmatpush1.bf16.msra.mxu0 %v905_v19  ;;  %2780 = vmatprep.subr.bf16.mxu1 %v908_v20 }
  0xff   : > { %2012 = vmatprep.subr.bf16.mxu0 %v908_v20 }
 0x101   : > { %2795 = vmatpush1.bf16.msra.mxu1 %v907_v25 }
 0x102   : > { %2013 = vmatpush1.bf16.msra.mxu0 %v907_v25  ;;  %2781 = vmatprep.subr.bf16.mxu1 %v910_v26 }
 0x103   : > { %2014 = vmatprep.subr.bf16.mxu0 %v910_v26 }
 0x105   : > { %2796 = vmatpush1.bf16.msra.mxu1 %v909_v31 }
 0x106   : > { %2015 = vmatpush1.bf16.msra.mxu0 %v909_v31  ;;  %2782 = vmatprep.subr.bf16.mxu1 %v912_v32 }
 0x107   : > { %2016 = vmatprep.subr.bf16.mxu0 %v912_v32 }
 0x109   : > { %2797 = vmatpush1.bf16.msra.mxu1 %v911_v35 }
 0x10a   : > { %2017 = vmatpush1.bf16.msra.mxu0 %v911_v35 }
 0x10c   : > { %2051 = vmatmul.mubr.bf16.vlgmr.msra.gmra.mrb[24].mxu1 %v3099_v36 }
 0x10d   : > { %2021 = vmatmul.mubr.bf16.vlgmr.msra.gmra.mrb[0].mxu0 %v3096_v37  ;;  %2759 = vmatprep.mubr.msk.bf16.mxu1 %vm1411_vm0, %v3104_v38 }
 0x10e   : > { %2756 = vmatprep.mubr.msk.bf16.mxu0 %vm1411_vm0, %v3102_v39 }
 0x114   : > { %2061 = vmatmul.mubr.bf16.gmra.mrb[28].mxu1 %v3107_v40 }
 0x115   : > { %2031 = vmatmul.mubr.bf16.gmra.mrb[4].mxu0 %v3106_v41  ;;  %2760 = vmatprep.mubr.msk.bf16.mxu1 %vm1411_vm0, %v3110_v42 }
 0x116   : > { %2757 = vmatprep.mubr.msk.bf16.mxu0 %vm1411_vm0, %v3108_v43 }
 0x11c   : > { %2071 = vmatmul.mubr.bf16.gmra.mrb[32].mxu1 %v3113_v44 }
 0x11d   : > { %2041 = vmatmul.mubr.bf16.gmra.mrb[8].mxu0 %v3112_v45 }
 0x1a3   : > { %v1650_v46 = vpop.f32.mrb[0].mxu1 }
 0x1a4   : > { %v1652_v47 = vpop.f32.mrb[1].mxu1 }
 0x1a5   : > { %v1654_v48 = vpop.f32.mrb[2].mxu1 }
 0x1a6   : > { %v1656_v49 = vpop.f32.mrb[3].mxu1 }
 0x1ab   : > { %v4720_v50 = vpop.f32.mrb[4].mxu1 }
 0x1ac   : > { %v4722_v51 = vpop.f32.mrb[5].mxu1 }
 0x1ad   : > { %v4724_v52 = vpop.f32.mrb[6].mxu1 }
 0x1ae   : > { %v4726_v53 = vpop.f32.mrb[7].mxu1 }
 0x1b3   : > { %v4728_v54 = vpop.f32.mrb[8].mxu1 }
 0x1b4   : > { %v4730_v55 = vpop.f32.mrb[9].mxu1 }
 0x1b5   : > { %v4732_v56 = vpop.f32.mrb[10].mxu1 }
 0x1b6   : > { %v4734_v57 = vpop.f32.mrb[11].mxu1 }
 0x1bb   : > { %v1680_v58 = vpop.f32.mrb[12].mxu1 }
 0x1bc   : > { %v1959_v59 = vpop.f32.mrb[12].mxu0  ;;  %v1682_v60 = vpop.f32.mrb[13].mxu1 }
 0x1bd   : > { %v2810_v61 = vadd.f32 %v1959_v59, %v1680_v58  ;;  %v1961_v62 = vpop.f32.mrb[13].mxu0  ;;  %v1684_v63 = vpop.f32.mrb[14].mxu1 }
 0x1be   : > { %v2812_v0 = vadd.f32 %v1961_v62, %v1682_v60  ;;  %v1963_v1 = vpop.f32.mrb[14].mxu0  ;;  %v1686_v2 = vpop.f32.mrb[15].mxu1 }
 0x1bf   : > { %v2814_v3 = vadd.f32 %v1963_v1, %v1684_v63  ;;  %v1965_v4 = vpop.f32.mrb[15].mxu0 }
 0x1c0   : > { %v2816_v5 = vadd.f32 %v1965_v4, %v1686_v2 }
 0x1c3   : > { %v1690_v6 = vpop.f32.mrb[16].mxu1 }
 0x1c4   : > { %v1969_v7 = vpop.f32.mrb[16].mxu0  ;;  %v1692_v8 = vpop.f32.mrb[17].mxu1 }
 0x1c5   : > { %v2818_v9 = vadd.f32 %v1969_v7, %v1690_v6  ;;  %v1971_v10 = vpop.f32.mrb[17].mxu0  ;;  %v1694_v11 = vpop.f32.mrb[18].mxu1 }
 0x1c6   : > { %v2820_v12 = vadd.f32 %v1971_v10, %v1692_v8  ;;  %v1973_v13 = vpop.f32.mrb[18].mxu0  ;;  %v1696_v14 = vpop.f32.mrb[19].mxu1 }
 0x1c7   : > { %v2822_v15 = vadd.f32 %v1973_v13, %v1694_v11  ;;  %v1975_v16 = vpop.f32.mrb[19].mxu0 }
 0x1c8   : > { %v2824_v17 = vadd.f32 %v1975_v16, %v1696_v14 }
 0x1cb   : > { %v1700_v18 = vpop.f32.mrb[20].mxu1 }
 0x1cc   : > { %v1979_v19 = vpop.f32.mrb[20].mxu0  ;;  %v1702_v20 = vpop.f32.mrb[21].mxu1 }
 0x1cd   : > { %v4736_v21 = vadd.f32 %v1979_v19, %v1700_v18  ;;  %v1981_v22 = vpop.f32.mrb[21].mxu0  ;;  %v1704_v23 = vpop.f32.mrb[22].mxu1 }
 0x1ce   : > { %v4738_v24 = vadd.f32 %v1981_v22, %v1702_v20  ;;  %v1983_v25 = vpop.f32.mrb[22].mxu0  ;;  %v1706_v26 = vpop.f32.mrb[23].mxu1 }
 0x1cf   : > { %v4740_v27 = vadd.f32 %v1983_v25, %v1704_v23  ;;  %v1985_v28 = vpop.f32.mrb[23].mxu0 }
 0x1d0   : > { %v4742_v29 = vadd.f32 %v1985_v28, %v1706_v26 }
 0x1df   : > { %v2052_v30 = vpop.f32.mrb[24].mxu1 }
 0x1e0   : > { %v2022_v31 = vpop.f32.mrb[0].mxu0  ;;  %v4744_v32 = vadd.f32 %v2810_v61, %v2052_v30  ;;  %v2054_v33 = vpop.f32.mrb[25].mxu1 }
 0x1e1   : > { %v4746_v34 = vadd.f32 %v2022_v31, %v1650_v46  ;;  %v2024_v35 = vpop.f32.mrb[1].mxu0  ;;  %v4748_v36 = vadd.f32 %v2812_v0, %v2054_v33  ;;  %v2056_v37 = vpop.f32.mrb[26].mxu1 }
 0x1e2   : > { %v4750_v38 = vadd.f32 %v2024_v35, %v1652_v47  ;;  %v2026_v39 = vpop.f32.mrb[2].mxu0  ;;  %v4752_v40 = vadd.f32 %v2814_v3, %v2056_v37  ;;  %v2058_v41 = vpop.f32.mrb[27].mxu1 }
 0x1e3   : > { %v4754_v42 = vadd.f32 %v2026_v39, %v1654_v48  ;;  %v2028_v43 = vpop.f32.mrb[3].mxu0  ;;  %v4756_v44 = vadd.f32 %v2816_v5, %v2058_v41  ;;  %v2106_v60 = vsel %vm2081_vm1, %v4748_v36, 0.0  ;;  %v2130_v25 = vmul.f32 %v4746_v34, %v4746_v34 }
 0x1e4   : > { %v4758_v45 = vadd.f32 %v2028_v43, %v1656_v49  ;;  %v2082_v46 = vsel %vm2081_vm1, %v4750_v38, 0.0  ;;  %v2107_v7 = vadd.f32 %v4744_v32, %v2106_v60 }
 0x1e5   : > { %v2083_v58 = vadd.f32 %v4746_v34, %v2082_v46  ;;  %v2110_v47 = vsel %vm2081_vm1, %v4756_v44, 0.0  ;;  %v2145_v49 = vmul.f32 %v4756_v44, %v4756_v44  ;;  %v2132_v1 = vmul.f32 %v4754_v42, %v4754_v42 }
 0x1e6   : > { %v2111_v59 = vadd.f32 %v4752_v40, %v2110_v47  ;;  %v2133_v48 = vmul.f32 %v4758_v45, %v4758_v45  ;;  %v2086_v8 = vsel %vm2081_vm1, %v4758_v45, 0.0 }
 0x1e7   : > { %2084 = vadd.xlane.f32.xlu0 %v2083_v58  ;;  %v2062_v61 = vpop.f32.mrb[28].mxu1  ;;  %v2182_v19 = vsel %vm2081_vm1, %v2145_v49, 0.0  ;;  %v2087_v20 = vadd.f32 %v4754_v42, %v2086_v8 }
 0x1e8   : > { %v2032_v62 = vpop.f32.mrb[4].mxu0  ;;  %v4772_v63 = vadd.f32 %v2818_v9, %v2062_v61  ;;  %v2064_v0 = vpop.f32.mrb[29].mxu1  ;;  %2112 = vadd.xlane.f32.xlu1 %v2111_v59  ;;  %v2158_v2 = vsel %vm2081_vm1, %v2133_v48, 0.0 }
 0x1e9   : > { %v4778_v3 = vadd.f32 %v2032_v62, %v4720_v50  ;;  %v2034_v4 = vpop.f32.mrb[5].mxu0  ;;  %v4780_v5 = vadd.f32 %v2820_v12, %v2064_v0  ;;  %v2066_v6 = vpop.f32.mrb[30].mxu1  ;;  %v2159_v14 = vadd.f32 %v2158_v2, %v2132_v1  ;;  %v2131_v50 = vmul.f32 %v4750_v38, %v4750_v38 }
 0x1ea   : > { %v4786_v9 = vadd.f32 %v2034_v4, %v4722_v51  ;;  %v2036_v10 = vpop.f32.mrb[6].mxu0  ;;  %v4788_v11 = vadd.f32 %v2822_v15, %v2066_v6  ;;  %v2068_v13 = vpop.f32.mrb[31].mxu1  ;;  %v2144_v15 = vmul.f32 %v4752_v40, %v4752_v40 }
 0x1eb   : > { %v4793_v12 = vadd.f32 %v2036_v10, %v4724_v52  ;;  %v2038_v16 = vpop.f32.mrb[7].mxu0  ;;  %v4795_v18 = vadd.f32 %v2824_v17, %v2068_v13  ;;  %2108 = vadd.xlane.f32.xlu0 %v2107_v7  ;;  %v2154_v23 = vsel %vm2081_vm1, %v2131_v50, 0.0  ;;  %v2143_v52 = vmul.f32 %v4748_v36, %v4748_v36 }
 0x1ec   : > { %v4799_v51 = vadd.f32 %v2038_v16, %v4726_v53  ;;  %2160 = vadd.xlane.f32.xlu1 %v2159_v14  ;;  %v2183_v22 = vadd.f32 %v2182_v19, %v2144_v15  ;;  %v2090_v53 = vsel %vm2081_vm1, %v4786_v9, 0.0  ;;  %v2155_v39 = vadd.f32 %v2154_v23, %v2130_v25 }
 0x1ed   : > { %v2091_v58 = vadd.f32 %v4778_v3, %v2090_v53  ;;  %v2178_v47 = vsel %vm2081_vm1, %v2143_v52, 0.0  ;;  %v2118_v49 = vsel %vm2081_vm1, %v4795_v18, 0.0  ;;  %v2147_v2 = vmul.f32 %v4780_v5, %v4780_v5 }
 0x1ee   : > { %v2137_v62 = vmul.f32 %v4799_v51, %v4799_v51  ;;  %v2119_v0 = vadd.f32 %v4788_v11, %v2118_v49  ;;  %v2134_v4 = vmul.f32 %v4778_v3, %v4778_v3  ;;  %v2149_v7 = vmul.f32 %v4795_v18, %v4795_v18 }
 0x1ef   : > { %2088 = vadd.xlane.f32.xlu0 %v2087_v20  ;;  %v2072_v17 = vpop.f32.mrb[32].mxu1  ;;  %v2136_v8 = vmul.f32 %v4793_v12, %v4793_v12  ;;  %v2186_v14 = vsel %vm2081_vm1, %v2147_v2, 0.0  ;;  %v2146_v50 = vmul.f32 %v4772_v63, %v4772_v63  ;;  %v2148_v19 = vmul.f32 %v4788_v11, %v4788_v11 }
 0x1f0   : > { %v2042_v26 = vpop.f32.mrb[8].mxu0  ;;  %v4812_v28 = vadd.f32 %v4736_v21, %v2072_v17  ;;  %v2074_v30 = vpop.f32.mrb[33].mxu1  ;;  %2184 = vadd.xlane.f32.xlu1 %v2183_v22  ;;  %v2166_v6 = vsel %vm2081_vm1, %v2137_v62, 0.0  ;;  %v2190_v16 = vsel %vm2081_vm1, %v2149_v7, 0.0 }
 0x1f1   : > { %v4815_v31 = vadd.f32 %v2042_v26, %v4728_v54  ;;  %v2044_v33 = vpop.f32.mrb[9].mxu0  ;;  %v4818_v35 = vadd.f32 %v4738_v24, %v2074_v30  ;;  %v2076_v37 = vpop.f32.mrb[34].mxu1  ;;  %v2167_v13 = vadd.f32 %v2166_v6, %v2136_v8  ;;  %v2187_v15 = vadd.f32 %v2186_v14, %v2146_v50 }
 0x1f2   : > { %v4821_v41 = vadd.f32 %v2044_v33, %v4730_v55  ;;  %v2046_v43 = vpop.f32.mrb[10].mxu0  ;;  %v4824_v46 = vadd.f32 %v4740_v27, %v2076_v37  ;;  %v2078_v21 = vpop.f32.mrb[35].mxu1  ;;  %v2142_v55 = vmul.f32 %v4744_v32, %v4744_v32  ;;  %v2094_v27 = vsel %vm2081_vm1, %v4799_v51, 0.0 }
 0x1f3   : > { %v4829_v54 = vadd.f32 %v2046_v43, %v4732_v56  ;;  %v2048_v59 = vpop.f32.mrb[11].mxu0  ;;  %v4832_v24 = vadd.f32 %v4742_v29, %v2078_v21  ;;  %2156 = vadd.xlane.f32.xlu0 %v2155_v39  ;;  %v2095_v61 = vadd.f32 %v4793_v12, %v2094_v27  ;;  %v2114_v56 = vsel %vm2081_vm1, %v4780_v5, 0.0 }
 0x1f4   : > { %v4839_v60 = vadd.f32 %v2048_v59, %v4734_v57  ;;  %2092 = vadd.xlane.f32.xlu1 %v2091_v58  ;;  %v2179_v48 = vadd.f32 %v2178_v47, %v2142_v55  ;;  %v2135_v29 = vmul.f32 %v4786_v9, %v4786_v9  ;;  %v2115_v57 = vadd.f32 %v4772_v63, %v2114_v56 }
 0x1f5   : > { %v2191_v20 = vadd.f32 %v2190_v16, %v2148_v19  ;;  %v2098_v22 = vsel %vm2081_vm1, %v4821_v41, 0.0  ;;  %v2122_v25 = vsel %vm2081_vm1, %v4818_v35, 0.0  ;;  %v2139_v53 = vmul.f32 %v4821_v41, %v4821_v41 }
 0x1f6   : > { %v2162_v1 = vsel %vm2081_vm1, %v2135_v29, 0.0  ;;  %v2102_v23 = vsel %vm2081_vm1, %v4839_v60, 0.0  ;;  %v2099_v52 = vadd.f32 %v4815_v31, %v2098_v22  ;;  %v2126_v26 = vsel %vm2081_vm1, %v4832_v24, 0.0 }
 0x1f7   : > { %2180 = vadd.xlane.f32.xlu0 %v2179_v48  ;;  %v2163_v10 = vadd.f32 %v2162_v1, %v2134_v4  ;;  %v2103_v17 = vadd.f32 %v4829_v54, %v2102_v23  ;;  %v2141_v30 = vmul.f32 %v4839_v60, %v4839_v60  ;;  %v2123_v33 = vadd.f32 %v4812_v28, %v2122_v25 }
 0x1f8   : > { %2096 = vadd.xlane.f32.xlu1 %v2095_v61  ;;  %v2127_v37 = vadd.f32 %v4824_v46, %v2126_v26  ;;  %v2170_v39 = vsel %vm2081_vm1, %v2139_v53, 0.0  ;;  %v2151_v43 = vmul.f32 %v4818_v35, %v4818_v35  ;;  %v2138_v21 = vmul.f32 %v4815_v31, %v4815_v31 }
 0x1f9   : > { %v2174_v58 = vsel %vm2081_vm1, %v2141_v30, 0.0  ;;  %v2153_v47 = vmul.f32 %v4832_v24, %v4832_v24  ;;  %v2140_v59 = vmul.f32 %v4829_v54, %v4829_v54  ;;  %v2150_v61 = vmul.f32 %v4812_v28, %v4812_v28 }
 0x1fa   : > { %v2171_v55 = vadd.f32 %v2170_v39, %v2138_v21  ;;  %v2194_v48 = vsel %vm2081_vm1, %v2151_v43, 0.0  ;;  %v2152_v29 = vmul.f32 %v4824_v46, %v4824_v46 }
 0x1fb   : > { %2116 = vadd.xlane.f32.xlu0 %v2115_v57  ;;  %v2175_v27 = vadd.f32 %v2174_v58, %v2140_v59  ;;  %v2198_v56 = vsel %vm2081_vm1, %v2153_v47, 0.0  ;;  %v2195_v49 = vadd.f32 %v2194_v48, %v2150_v61  ;;  %v3202_v57 = vmov 0  }
 0x1fc   : > { %2120 = vadd.xlane.f32.xlu1 %v2119_v0  ;;  %v2199_v62 = vadd.f32 %v2198_v56, %v2152_v29  ;;  %2986 = vset.pattern.permute.xlu0 %v3202_v57 }
 0x1fd   : > { %2987 = vset.pattern.permute.xlu1 %v3202_v57 }
 0x1ff   : > { %2164 = vadd.xlane.f32.xlu0 %v2163_v10 }
 0x200   : > { %2168 = vadd.xlane.f32.xlu1 %v2167_v13 }
 0x203   : > { %2188 = vadd.xlane.f32.xlu0 %v2187_v15 }
 0x204   : > { %2192 = vadd.xlane.f32.xlu1 %v2191_v20 }
 0x207   : > { %2100 = vadd.xlane.f32.xlu0 %v2099_v52 }
 0x208   : > { %2104 = vadd.xlane.f32.xlu1 %v2103_v17 }
 0x20b   : > { %2124 = vadd.xlane.f32.xlu0 %v2123_v33 }
 0x20c   : > { %2128 = vadd.xlane.f32.xlu1 %v2127_v37 }
 0x20f   : > { %2172 = vadd.xlane.f32.xlu0 %v2171_v55 }
 0x210   : > { %2176 = vadd.xlane.f32.xlu1 %v2175_v27 }
 0x213   : > { %2196 = vadd.xlane.f32.xlu0 %v2195_v49 }
 0x214   : > { %2200 = vadd.xlane.f32.xlu1 %v2199_v62 }
 0x274   : > { %v2085_v0 = vpop.xlane.xlu0 %2084 }
 0x275   : > { %v2113_v1 = vpop.xlane.xlu1 %2112  ;;  %v4902_v8 = vmul.f32 0.0051020407, %v2085_v0 }
 0x276   : > { %v4900_v6 = vmul.f32 0.0051020407, %v2113_v1 }
 0x277   : > { %v2227_v22 = vmul.f32 %v4902_v8, %v4902_v8 }
 0x278   : > { %v2109_v2 = vpop.xlane.xlu0 %2108  ;;  %v2234_v14 = vmul.f32 %v4900_v6, %v4900_v6 }
 0x279   : > { %v2161_v4 = vpop.xlane.xlu1 %2160  ;;  %v4908_v23 = vmul.f32 0.0051020407, %v2109_v2 }
 0x27a   : > { %v2216_v16 = vmul.f32 0.0051020407, %v2161_v4  ;;  %v2288_v4 = vld [vmem:[%s4920_s10 + $0x8] sm:$0xff] }
 0x27b   : > { %v2233_v39 = vmul.f32 %v4908_v23, %v4908_v23 }
 0x27c   : > { %v2089_v7 = vpop.xlane.xlu0 %2088 }
 0x27d   : > { %v2204_v10 = vmul.f32 0.0051020407, %v2089_v7  ;;  %v2185_v13 = vpop.xlane.xlu1 %2184 }
 0x27e   : > { %v2222_v50 = vmul.f32 0.0051020407, %v2185_v13 }
 0x27f   : > { %v2228_v19 = vmul.f32 %v2204_v10, %v2204_v10 }
 0x280   : > { %v2246_v15 = vsub.f32 %v2222_v50, %v2234_v14  ;;  %v2157_v20 = vpop.xlane.xlu0 %2156 }
 0x281   : > { %v2240_v52 = vsub.f32 %v2216_v16, %v2228_v19  ;;  %v2215_v17 = vmul.f32 0.0051020407, %v2157_v20  ;;  %v2093_v25 = vpop.xlane.xlu1 %2092  ;;  %v2294_v16 = vld [vmem:[%s4920_s10 + $0x38] sm:$0xff] }
 0x282   : > { %v2258_v53 = vmax.f32 %v2246_v15, 0.0  ;;  %v4922_v62 = vmul.f32 0.0051020407, %v2093_v25 }
 0x283   : > { %v2252_v26 = vmax.f32 %v2240_v52, 0.0  ;;  %v2239_v30 = vsub.f32 %v2215_v17, %v2227_v22  ;;  %v2287_v52 = vld [vmem:[%s4920_s10] sm:$0xff] }
 0x284   : > { %v2270_v33 = vadd.f32 1e-05, %v2258_v53  ;;  %v2181_v37 = vpop.xlane.xlu0 %2180  ;;  %v2229_v15 = vmul.f32 %v4922_v62, %v4922_v62 }
 0x285   : > { %v2264_v43 = vadd.f32 1e-05, %v2252_v26  ;;  %v2251_v21 = vmax.f32 %v2239_v30, 0.0  ;;  %v2221_v58 = vmul.f32 0.0051020407, %v2181_v37  ;;  %v2097_v47 = vpop.xlane.xlu1 %2096 }
 0x286   : > { %3114 = vrsqrt.f32 %v2270_v33  ;;  %v4913_v56 = vmul.f32 0.0051020407, %v2097_v47 }
 0x287   : > { %3116 = vrsqrt.f32 %v2264_v43  ;;  %v2263_v59 = vadd.f32 1e-05, %v2251_v21  ;;  %v2245_v55 = vsub.f32 %v2221_v58, %v2233_v39 }
 0x288   : > { %v2117_v27 = vpop.xlane.xlu0 %2116  ;;  %v2230_v0 = vmul.f32 %v4913_v56, %v4913_v56 }
 0x289   : > { %3118 = vrsqrt.f32 %v2263_v59  ;;  %v2257_v48 = vmax.f32 %v2245_v55, 0.0  ;;  %v2121_v61 = vpop.xlane.xlu1 %2120  ;;  %v4932_v20 = vmul.f32 0.0051020407, %v2117_v27 }
 0x28a   : > { %v4926_v1 = vmul.f32 0.0051020407, %v2121_v61  ;;  %v2293_v61 = vld [vmem:[%s4920_s10 + $0x30] sm:$0xff] }
 0x28b   : > { %v2269_v29 = vadd.f32 1e-05, %v2257_v48  ;;  %v2235_v55 = vmul.f32 %v4932_v20, %v4932_v20  ;;  %v2312_v48 = vld [vmem:[%s4942_s13 + $0x8] sm:$0xff] }
 0x28c   : > { %v2165_v49 = vpop.xlane.xlu0 %2164  ;;  %v2236_v25 = vmul.f32 %v4926_v1, %v4926_v1 }
 0x28d   : > { %3120 = vrsqrt.f32 %v2269_v29  ;;  %v2169_v57 = vpop.xlane.xlu1 %2168  ;;  %v2217_v7 = vmul.f32 0.0051020407, %v2165_v49 }
 0x28e   : > { %v2218_v2 = vmul.f32 0.0051020407, %v2169_v57 }
 0x28f   : > { %v2241_v33 = vsub.f32 %v2217_v7, %v2229_v15 }
 0x290   : > { %v3115_v13 = vpop.eup %3114  ;;  %v2242_v14 = vsub.f32 %v2218_v2, %v2230_v0  ;;  %v2189_v50 = vpop.xlane.xlu0 %2188 }
 0x291   : > { %v3117_v19 = vpop.eup %3116  ;;  %v2193_v22 = vpop.xlane.xlu1 %2192  ;;  %v2223_v37 = vmul.f32 0.0051020407, %v2189_v50  ;;  %v2306_v39 = vmul.f32 %v3115_v13, %v2294_v16  ;;  %v2253_v57 = vmax.f32 %v2241_v33, 0.0  ;;  %v2318_v50 = vld [vmem:[%s4942_s13 + $0x38] sm:$0xff] }
 0x292   : > { %v2300_v17 = vmul.f32 %v3117_v19, %v2288_v4  ;;  %v2254_v53 = vmax.f32 %v2242_v14, 0.0  ;;  %v2224_v26 = vmul.f32 0.0051020407, %v2193_v22 }
 0x293   : > { %v3119_v30 = vpop.eup %3118  ;;  %v2247_v0 = vsub.f32 %v2223_v37, %v2235_v55  ;;  %v2330_v13 = vmul.f32 %v2306_v39, %v4900_v6  ;;  %v2265_v19 = vadd.f32 1e-05, %v2253_v57 }
 0x294   : > { %v2324_v43 = vmul.f32 %v2300_v17, %v2204_v10  ;;  %v2266_v21 = vadd.f32 1e-05, %v2254_v53  ;;  %v2248_v58 = vsub.f32 %v2224_v26, %v2236_v25  ;;  %v2101_v47 = vpop.xlane.xlu0 %2100  ;;  %v2299_v59 = vmul.f32 %v3119_v30, %v2287_v52  ;;  %v2290_v30 = vld [vmem:[%s4920_s10 + $0x18] sm:$0xff] }
 0x295   : > { %v2105_v27 = vpop.xlane.xlu1 %2104  ;;  %v2259_v15 = vmax.f32 %v2247_v0, 0.0  ;;  %v2342_v22 = vsub.f32 %v2318_v50, %v2330_v13 }
 0x296   : > { %3122 = vrsqrt.f32 %v2266_v21  ;;  %v2260_v29 = vmax.f32 %v2248_v58, 0.0  ;;  %2349 = vperm.xlu0 %2986, %v2299_v59   ;;  %v2336_v10 = vsub.f32 %v2312_v48, %v2324_v43  ;;  %v4950_v16 = vmul.f32 0.0051020407, %v2105_v27  ;;  %v2311_v27 = vld [vmem:[%s4942_s13] sm:$0xff] }
 0x297   : > { %v3121_v49 = vpop.eup %3120  ;;  %v2271_v33 = vadd.f32 1e-05, %v2259_v15  ;;  %v2323_v21 = vmul.f32 %v2299_v59, %v4902_v8  ;;  %v4958_v58 = vmul.f32 0.0051020407, %v2101_v47 }
 0x298   : > { %v2272_v2 = vadd.f32 1e-05, %v2260_v29  ;;  %v2125_v4 = vpop.xlane.xlu0 %2124  ;;  %v2305_v7 = vmul.f32 %v3121_v49, %v2293_v61  ;;  %v2232_v25 = vmul.f32 %v4950_v16, %v4950_v16 }
 0x299   : > { %v2129_v14 = vpop.xlane.xlu1 %2128  ;;  %v2335_v47 = vsub.f32 %v2311_v27, %v2323_v21  ;;  %v2231_v13 = vmul.f32 %v4958_v58, %v4958_v58 }
 0x29a   : > { %3124 = vrsqrt.f32 %v2272_v2  ;;  %2438 = vperm.xlu0 %2986, %v2336_v10   ;;  %2379 = vperm.xlu1 %2987, %v2305_v7   ;;  %v4954_v53 = vmul.f32 0.0051020407, %v2129_v14  ;;  %v2329_v59 = vmul.f32 %v2305_v7, %v4908_v23  ;;  %v4967_v14 = vmul.f32 0.0051020407, %v2125_v4 }
 0x29b   : > { %3126 = vrsqrt.f32 %v2265_v19  ;;  %v2317_v19 = vld [vmem:[%s4942_s13 + $0x30] sm:$0xff] }
 0x29c   : > { %v2173_v26 = vpop.xlane.xlu0 %2172  ;;  %v2238_v61 = vmul.f32 %v4954_v53, %v4954_v53  ;;  %3128 = vrsqrt.f32 %v2271_v33  ;;  %v2341_v23 = vsub.f32 %v2317_v19, %v2329_v59  ;;  %v2237_v4 = vmul.f32 %v4967_v14, %v4967_v14  ;;  %v2320_v33 = vld [vmem:[%s4942_s13 + $0x48] sm:$0xff] }
 0x29d   : > { %v2177_v52 = vpop.xlane.xlu1 %2176  ;;  %v2219_v57 = vmul.f32 0.0051020407, %v2173_v26  ;;  %v2316_v19 = vld [vmem:[%s4942_s13 + $0x28] sm:$0xff] }
 0x29e   : > { %v2220_v6 = vmul.f32 0.0051020407, %v2177_v52  ;;  %2468 = vperm.xlu0 %2986, %v2342_v22   ;;  %2354 = vperm.xlu1 %2987, %v2300_v17   ;;  %v2296_v17 = vld [vmem:[%s4920_s10 + $0x48] sm:$0xff]  ;;  %v2314_v22 = vld [vmem:[%s4942_s13 + $0x18] sm:$0xff] }
 0x29f   : > { %v2243_v52 = vsub.f32 %v2219_v57, %v2231_v13  ;;  %v2313_v13 = vld [vmem:[%s4942_s13 + $0x10] sm:$0xff] }
 0x2a0   : > { %v3123_v37 = vpop.eup %3122  ;;  %v2244_v43 = vsub.f32 %v2220_v6, %v2232_v25  ;;  %v2197_v10 = vpop.xlane.xlu0 %2196 }
 0x2a1   : > { %v2201_v55 = vpop.xlane.xlu1 %2200  ;;  %v2302_v48 = vmul.f32 %v3123_v37, %v2290_v30  ;;  %v2225_v25 = vmul.f32 0.0051020407, %v2197_v10  ;;  %v2289_v30 = vld [vmem:[%s4920_s10 + $0x10] sm:$0xff]  ;;  %v2255_v37 = vmax.f32 %v2243_v52, 0.0  ;;  %v2319_v52 = vld [vmem:[%s4942_s13 + $0x40] sm:$0xff] }
 0x2a2   : > { %v2256_v29 = vmax.f32 %v2244_v43, 0.0  ;;  %v2226_v49 = vmul.f32 0.0051020407, %v2201_v55  ;;  %2384 = vperm.xlu1 %2987, %v2306_v39  }
 0x2a3   : > { %v2326_v39 = vmul.f32 %v2302_v48, %v4913_v56  ;;  %v2249_v43 = vsub.f32 %v2225_v25, %v2237_v4 }
 0x2a4   : > { %v3125_v0 = vpop.eup %3124  ;;  %v2268_v2 = vadd.f32 1e-05, %v2256_v29  ;;  %v2250_v8 = vsub.f32 %v2226_v49, %v2238_v61  ;;  %v2295_v61 = vld [vmem:[%s4920_s10 + $0x40] sm:$0xff]  ;;  %v2292_v29 = vld [vmem:[%s4920_s10 + $0x28] sm:$0xff]  ;;  %v2267_v49 = vadd.f32 1e-05, %v2255_v37 }
 0x2a5   : > { %v2308_v50 = vmul.f32 %v3125_v0, %v2296_v17  ;;  %v3127_v7 = vpop.eup %3126  ;;  %v2338_v6 = vsub.f32 %v2314_v22, %v2326_v39  ;;  %v2261_v17 = vmax.f32 %v2249_v43, 0.0  ;;  %v2321_v37 = vld [vmem:[%s4942_s13 + $0x50] sm:$0xff] }
 0x2a6   : > { %3130 = vrsqrt.f32 %v2268_v2  ;;  %v2262_v15 = vmax.f32 %v2250_v8, 0.0  ;;  %2433 = vperm.xlu1 %2987, %v2335_v47   ;;  %v2301_v21 = vmul.f32 %v3127_v7, %v2289_v30  ;;  %v3129_v55 = vpop.eup %3128  ;;  %v2298_v2 = vld [vmem:[%s4920_s10 + $0x58] sm:$0xff]  ;;  %v2315_v30 = vld [vmem:[%s4942_s13 + $0x20] sm:$0xff] }
 0x2a7   : > { %2394 = vperm.xlu0 %2986, %v2308_v50   ;;  %v2332_v56 = vmul.f32 %v2308_v50, %v4926_v1  ;;  %v2307_v1 = vmul.f32 %v3129_v55, %v2295_v61  ;;  %v2273_v10 = vadd.f32 1e-05, %v2261_v17 }
 0x2a8   : > { %v2274_v26 = vadd.f32 1e-05, %v2262_v15  ;;  %v2325_v47 = vmul.f32 %v2301_v21, %v4922_v62  ;;  %v2322_v62 = vld [vmem:[%s4942_s13 + $0x58] sm:$0xff] }
 0x2a9   : > { %v2344_v27 = vsub.f32 %v2320_v33, %v2332_v56  ;;  %v2331_v15 = vmul.f32 %v2307_v1, %v4932_v20 }
 0x2aa   : > { %3132 = vrsqrt.f32 %v2274_v26  ;;  %2463 = vperm.xlu1 %2987, %v2341_v23   ;;  %v2337_v39 = vsub.f32 %v2313_v13, %v2325_v47 }
 0x2ab   : > { %2448 = vperm.xlu0 %2986, %v2338_v6   ;;  %3134 = vrsqrt.f32 %v2267_v49  ;;  %v2343_v26 = vsub.f32 %v2319_v52, %v2331_v15  ;;  %v2297_v6 = vld [vmem:[%s4920_s10 + $0x50] sm:$0xff] }
 0x2ac   : > { %3136 = vrsqrt.f32 %v2273_v10 }
 0x2ae   : > { %2359 = vperm.xlu1 %2987, %v2301_v21  }
 0x2af   : > { %2478 = vperm.xlu0 %2986, %v2344_v27  }
 0x2b0   : > { %v3131_v57 = vpop.eup %3130 }
 0x2b1   : > { %v2304_v0 = vmul.f32 %v3131_v57, %v2292_v29 }
 0x2b2   : > { %2389 = vperm.xlu1 %2987, %v2307_v1  }
 0x2b3   : > { %v2328_v50 = vmul.f32 %v2304_v0, %v4950_v16 }
 0x2b4   : > { %v3133_v8 = vpop.eup %3132 }
 0x2b5   : > { %v2310_v59 = vmul.f32 %v3133_v8, %v2298_v2  ;;  %v2340_v22 = vsub.f32 %v2316_v19, %v2328_v50  ;;  %v3135_v23 = vpop.eup %3134 }
 0x2b6   : > { %2364 = vperm.xlu1 %2987, %v2302_v48   ;;  %v2291_v48 = vld [vmem:[%s4920_s10 + $0x20] sm:$0xff]  ;;  %v3137_v4 = vpop.eup %3136 }
 0x2b7   : > { %2404 = vperm.xlu0 %2986, %v2310_v59   ;;  %v2334_v25 = vmul.f32 %v2310_v59, %v4954_v53  ;;  %v2303_v7 = vmul.f32 %v3135_v23, %v2291_v48  ;;  %v2309_v20 = vmul.f32 %v3137_v4, %v2297_v6 }
 0x2b9   : > { %v2346_v16 = vsub.f32 %v2322_v62, %v2334_v25  ;;  %v2327_v53 = vmul.f32 %v2303_v7, %v4958_v58  ;;  %v2333_v33 = vmul.f32 %v2309_v20, %v4967_v14 }
 0x2ba   : > { %2443 = vperm.xlu1 %2987, %v2337_v39  }
 0x2bb   : > { %2458 = vperm.xlu0 %2986, %v2340_v22   ;;  %v2339_v56 = vsub.f32 %v2315_v30, %v2327_v53  ;;  %v2345_v43 = vsub.f32 %v2321_v37, %v2333_v33 }
 0x2be   : > { %2473 = vperm.xlu1 %2987, %v2343_v26  }
 0x2bf   : > { %2488 = vperm.xlu0 %2986, %v2346_v16  }
 0x2c2   : > { %2369 = vperm.xlu1 %2987, %v2303_v7  }
 0x2c6   : > { %2399 = vperm.xlu1 %2987, %v2309_v20  }
 0x2ca   : > { %2374 = vperm.xlu1 %2987, %v2304_v0  }
 0x2ce   : > { %2453 = vperm.xlu1 %2987, %v2339_v56  }
 0x2d2   : > { %2483 = vperm.xlu1 %2987, %v2345_v43  }
 0x315   : > { %v2350_v21 = vpop.permute.xlu0 %2349 }
 0x316   : > { %v2407_v8 = vmul.f32 %v4746_v34, %v2350_v21  ;;  %v2408_v47 = vmul.f32 %v4750_v38, %v2350_v21 }
 0x319   : > { %v2380_v55 = vpop.permute.xlu1 %2379  ;;  %v2439_v27 = vpop.permute.xlu0 %2438 }
 0x31a   : > { %v2419_v38 = vmul.f32 %v4744_v32, %v2380_v55  ;;  %v2420_v19 = vmul.f32 %v4748_v36, %v2380_v55 }
 0x31d   : > { %v2355_v61 = vpop.permute.xlu1 %2354  ;;  %v2469_v0 = vpop.permute.xlu0 %2468 }
 0x31e   : > { %v2409_v29 = vmul.f32 %v4754_v42, %v2355_v61  ;;  %v2410_v58 = vmul.f32 %v4758_v45, %v2355_v61 }
 0x320   : > { %v2493_v49 = vadd.f32 %v2439_v27, %v2409_v29  ;;  %v2494_v17 = vadd.f32 %v2439_v27, %v2410_v58 }
 0x321   : > { %v2385_v57 = vpop.permute.xlu1 %2384 }
 0x322   : > { %v2517_v1 = vmax.f32 %v2493_v49, 0.0  ;;  %v2518_v14 = vmax.f32 %v2494_v17, 0.0  ;;  %v2421_v2 = vmul.f32 %v4752_v40, %v2385_v57  ;;  %v2422_v10 = vmul.f32 %v4756_v44, %v2385_v57 }
 0x324   : > { %2541 = vst [vmem:[%s5003_s20 + $0x10] sm:$0xff] %v2517_v1  ;;  %2542 = vst.msk [vmem:[%s5003_s20 + $0x18] sm:$0xff] %vm2081_vm1, %v2518_v14  ;;  %v2505_v42 = vadd.f32 %v2469_v0, %v2421_v2  ;;  %v2506_v45 = vadd.f32 %v2469_v0, %v2422_v10 }
 0x325   : > { %v2434_v40 = vpop.permute.xlu1 %2433 }
 0x326   : > { %v2529_v59 = vmax.f32 %v2505_v42, 0.0  ;;  %v2530_v44 = vmax.f32 %v2506_v45, 0.0  ;;  %v2491_v13 = vadd.f32 %v2434_v40, %v2407_v8  ;;  %v2492_v34 = vadd.f32 %v2434_v40, %v2408_v47  ;;  %v2395_v50 = vpop.permute.xlu0 %2394 }
 0x327   : > { %v2425_v36 = vmul.f32 %v4788_v11, %v2395_v50  ;;  %v2426_v23 = vmul.f32 %v4795_v18, %v2395_v50 }
 0x328   : > { %2553 = vst [vmem:[%s5003_s20 + $0x70] sm:$0xff] %v2529_v59  ;;  %2554 = vst.msk [vmem:[%s5003_s20 + $0x78] sm:$0xff] %vm2081_vm1, %v2530_v44  ;;  %v2515_v39 = vmax.f32 %v2491_v13, 0.0  ;;  %v2516_v15 = vmax.f32 %v2492_v34, 0.0 }
 0x329   : > { %v2464_v22 = vpop.permute.xlu1 %2463 }
 0x32a   : > { %2539 = vst [vmem:[%s5003_s20] sm:$0xff] %v2515_v39  ;;  %2540 = vst.msk [vmem:[%s5003_s20 + $0x8] sm:$0xff] %vm2081_vm1, %v2516_v15  ;;  %v2503_v52 = vadd.f32 %v2464_v22, %v2419_v38  ;;  %v2504_v25 = vadd.f32 %v2464_v22, %v2420_v19  ;;  %v2449_v62 = vpop.permute.xlu0 %2448 }
 0x32c   : > { %v2527_v26 = vmax.f32 %v2503_v52, 0.0  ;;  %v2528_v32 = vmax.f32 %v2504_v25, 0.0 }
 0x32d   : > { %v2360_v16 = vpop.permute.xlu1 %2359 }
 0x32e   : > { %2551 = vst [vmem:[%s5003_s20 + $0x60] sm:$0xff] %v2527_v26  ;;  %2552 = vst.msk [vmem:[%s5003_s20 + $0x68] sm:$0xff] %vm2081_vm1, %v2528_v32  ;;  %v2479_v48 = vpop.permute.xlu0 %2478  ;;  %v2411_v33 = vmul.f32 %v4778_v3, %v2360_v16  ;;  %v2412_v37 = vmul.f32 %v4786_v9, %v2360_v16 }
 0x32f   : > { %v2509_v7 = vadd.f32 %v2479_v48, %v2425_v36  ;;  %v2510_v4 = vadd.f32 %v2479_v48, %v2426_v23 }
 0x331   : > { %v2533_v6 = vmax.f32 %v2509_v7, 0.0  ;;  %v2534_v20 = vmax.f32 %v2510_v4, 0.0  ;;  %v2390_v53 = vpop.permute.xlu1 %2389 }
 0x332   : > { %v2424_v17 = vmul.f32 %v4780_v5, %v2390_v53 }
 0x333   : > { %2557 = vst [vmem:[%s5003_s20 + $0x90] sm:$0xff] %v2533_v6  ;;  %2558 = vst.msk [vmem:[%s5003_s20 + $0x98] sm:$0xff] %vm2081_vm1, %v2534_v20 }
 0x335   : > { %v2365_v30 = vpop.permute.xlu1 %2364 }
 0x336   : > { %v2413_v56 = vmul.f32 %v4793_v12, %v2365_v30  ;;  %v2414_v11 = vmul.f32 %v4799_v51, %v2365_v30  ;;  %v2405_v18 = vpop.permute.xlu0 %2404  ;;  %v2423_v12 = vmul.f32 %v4772_v63, %v2390_v53 }
 0x337   : > { %v2429_v9 = vmul.f32 %v4824_v46, %v2405_v18  ;;  %v2430_v57 = vmul.f32 %v4832_v24, %v2405_v18 }
 0x338   : > { %v2497_v43 = vadd.f32 %v2449_v62, %v2413_v56  ;;  %v2498_v21 = vadd.f32 %v2449_v62, %v2414_v11 }
 0x339   : > { %v2444_v55 = vpop.permute.xlu1 %2443 }
 0x33a   : > { %v2521_v27 = vmax.f32 %v2497_v43, 0.0  ;;  %v2522_v61 = vmax.f32 %v2498_v21, 0.0  ;;  %v2495_v29 = vadd.f32 %v2444_v55, %v2411_v33  ;;  %v2496_v58 = vadd.f32 %v2444_v55, %v2412_v37  ;;  %v2459_v49 = vpop.permute.xlu0 %2458 }
 0x33c   : > { %2545 = vst [vmem:[%s5003_s20 + $0x30] sm:$0xff] %v2521_v27  ;;  %2546 = vst.msk [vmem:[%s5003_s20 + $0x38] sm:$0xff] %vm2081_vm1, %v2522_v61  ;;  %v2519_v3 = vmax.f32 %v2495_v29, 0.0  ;;  %v2520_v51 = vmax.f32 %v2496_v58, 0.0 }
 0x33d   : > { %v2474_v1 = vpop.permute.xlu1 %2473 }
 0x33e   : > { %2543 = vst [vmem:[%s5003_s20 + $0x20] sm:$0xff] %v2519_v3  ;;  %2544 = vst.msk [vmem:[%s5003_s20 + $0x28] sm:$0xff] %vm2081_vm1, %v2520_v51  ;;  %v2507_v63 = vadd.f32 %v2474_v1, %v2423_v12  ;;  %v2508_v14 = vadd.f32 %v2474_v1, %v2424_v17  ;;  %v2489_v5 = vpop.permute.xlu0 %2488 }
 0x33f   : > { %v2513_v0 = vadd.f32 %v2489_v5, %v2429_v9  ;;  %v2514_v2 = vadd.f32 %v2489_v5, %v2430_v57 }
 0x340   : > { %v2531_v10 = vmax.f32 %v2507_v63, 0.0  ;;  %v2532_v8 = vmax.f32 %v2508_v14, 0.0 }
 0x341   : > { %v2537_v47 = vmax.f32 %v2513_v0, 0.0  ;;  %v2538_v42 = vmax.f32 %v2514_v2, 0.0  ;;  %v2370_v45 = vpop.permute.xlu1 %2369 }
 0x342   : > { %2555 = vst [vmem:[%s5003_s20 + $0x80] sm:$0xff] %v2531_v10  ;;  %2556 = vst.msk [vmem:[%s5003_s20 + $0x88] sm:$0xff] %vm2081_vm1, %v2532_v8  ;;  %v2415_v44 = vmul.f32 %v4815_v31, %v2370_v45  ;;  %v2416_v13 = vmul.f32 %v4821_v41, %v2370_v45 }
 0x343   : > { %2561 = vst [vmem:[%s5003_s20 + $0xb0] sm:$0xff] %v2537_v47  ;;  %2562 = vst.msk [vmem:[%s5003_s20 + $0xb8] sm:$0xff] %vm2081_vm1, %v2538_v42 }
 0x345   : > { %v2400_v46 = vpop.permute.xlu1 %2399 }
 0x346   : > { %v2427_v52 = vmul.f32 %v4812_v28, %v2400_v46 }
 0x349   : > { %v2375_v24 = vpop.permute.xlu1 %2374 }
 0x34a   : > { %v2417_v40 = vmul.f32 %v4829_v54, %v2375_v24  ;;  %v2418_v59 = vmul.f32 %v4839_v60, %v2375_v24  ;;  %v2428_v54 = vmul.f32 %v4818_v35, %v2400_v46 }
 0x34c   : > { %v2501_v34 = vadd.f32 %v2459_v49, %v2417_v40  ;;  %v2502_v50 = vadd.f32 %v2459_v49, %v2418_v59 }
 0x34d   : > { %v2454_v38 = vpop.permute.xlu1 %2453 }
 0x34e   : > { %v2525_v19 = vmax.f32 %v2501_v34, 0.0  ;;  %v2526_v39 = vmax.f32 %v2502_v50, 0.0  ;;  %v2499_v15 = vadd.f32 %v2454_v38, %v2415_v44  ;;  %v2500_v22 = vadd.f32 %v2454_v38, %v2416_v13 }
 0x350   : > { %2549 = vst [vmem:[%s5003_s20 + $0x50] sm:$0xff] %v2525_v19  ;;  %2550 = vst.msk [vmem:[%s5003_s20 + $0x58] sm:$0xff] %vm2081_vm1, %v2526_v39  ;;  %v2523_v31 = vmax.f32 %v2499_v15, 0.0  ;;  %v2524_v41 = vmax.f32 %v2500_v22, 0.0 }
 0x351   : > { %v2484_v60 = vpop.permute.xlu1 %2483 }
 0x352   : > { %2547 = vst [vmem:[%s5003_s20 + $0x40] sm:$0xff] %v2523_v31  ;;  %2548 = vst.msk [vmem:[%s5003_s20 + $0x48] sm:$0xff] %vm2081_vm1, %v2524_v41  ;;  %v2511_v25 = vadd.f32 %v2484_v60, %v2427_v52  ;;  %v2512_v62 = vadd.f32 %v2484_v60, %v2428_v54 }
 0x354   : > { %v2535_v28 = vmax.f32 %v2511_v25, 0.0  ;;  %v2536_v35 = vmax.f32 %v2512_v62, 0.0 }
 0x356   : > { %2559 = vst [vmem:[%s5003_s20 + $0xa0] sm:$0xff] %v2535_v28  ;;  %2560 = vst.msk [vmem:[%s5003_s20 + $0xa8] sm:$0xff] %vm2081_vm1, %v2536_v35 }
 0x357   : > { %3151 = shalt.err (!%p3148_p3)
}
 0x358   : > { %s3152_s9 = scalar_lea.hbm %s5063_s30, 3072  ;;  %s3156_s11 = scalar_lea.hbm %s5115_s4, 6144 }
 0x359   : > { %p3153_p4 = scmp.ne.s32.totalorder %s5063_s30, %s3152_s9  ;;  %p3157_p9 = scmp.lt.u32.totalorder %s5063_s30, %s5115_s4 }
 0x35a   : > { %p3158_p10 = scmp.lt.u32.totalorder %s3156_s11, %s3152_s9  ;;  %p3160_p12 = scmp.lt.u32.totalorder %s3152_s9, %s5063_s30 }
 0x35b   : > { %p3154_p7 = pnand %p3153_p4, %p3269_p5 }
 0x35c   : > { %p3159_p11 = por %p3158_p10, %p3157_p9 }
 0x35d   : > { %p3155_p8 = pneg %p3154_p7 }
 0x35e   : > { %p3161_p13 = por %p3160_p12, %p3159_p11 }
 0x360   : > { %p3162_p0 = pnand %p3161_p13, %p3155_p8 }
 0x362   : > { %3165 = shalt.err (!%p3162_p0)
}
 0x363   : > { %s3204_s14 = smov 256   ;;  %s3205_s20 = smov 16  }
 0x364   : > { %2944 = dma.vmem_to_hbm [thread:$0]  (%p3269_p5), %s5058_s23, 3072, %s5063_s30, %s5070_s19, %s3204_s14, %s3204_s14, %s3205_s20  }
 0x365 PF: > { %p2950_p1 = scmp.ge.s32.totalorder %s3200_s18, 2  ;;  %s2593_s22 = sand.u32 1, %s3188_s15  }
 0x366   : > { %s2594_s27 = scalar_lea.sflag [#allocation3], %s2593_s22 }
 0x367   : > { %p2947_p2 = pnand %p2950_p1, %p3273_p6 }
 0x369   : > { %3183 = dma.done.wait (!%p2947_p2), %s2594_s27, 3072  }
 0x36a   : > { %3185 = vsyncadd (!%p2947_p2), %s2594_s27, 4294964224  ;;  %p14_p3 = scmp.ge.s32.totalorder %s3256_s21, 4   ;;  %s5119_s15 = smov %s3192_s16 }
 0x36b   : > { %s5120_s16 = smov %s3196_s17  ;;  %s5121_s17 = smov %s3267_s24 }
 0x36c   : > { %s5122_s18 = smov %s3256_s21  ;;  %16 = sbr.rel (!%p14_p3) target bundleno = 3 (0x3), region = 77 }
 0x373   :  { %2599 = vsyncpa [#allocation3], 1 }
 0x374   :  { %2601 = vsyncpa [#allocation3 + $0x1], 1 }

</bundles_post_ra>
